<compile_context>
chip_gen: v7x
topology: tpu7x:2x2x1
jax: 0.10.0
libtpu: 0.0.40
codegen_flags: <defaults>
</compile_context>

<pallas_src>
import functools

import jax
import jax.numpy as jnp
from jax.experimental import pallas as pl
from jax.experimental.pallas import tpu as pltpu

FEAT_DIM = 2048   # InceptionV3.BLOCK_INDEX_BY_DIM[2048]


def _round_up(x, m):
    return (x + m - 1) // m * m


# --------------------------------------------------------------------------
# Kernel 1: fused feature projection + KID sufficient statistics, both image
# sets served per weight fetch.
#
#   grid = (nb, mb, kb)   nb: output-feature tile ("parallel", megacore axis)
#                         mb: batch tile
#                         kb: contraction tile (innermost, "arbitrary")
#
#   g_ref / r_ref : (TM, TK)  flattened gen / real image tiles (compute dtype)
#   w_ref         : (TK, TN)  projection-weight tile           (compute dtype)
#   colsum_ref    : (2, TN)   running  sum_i feat[set, i, :]          (f32)
#   sqcol_ref     : (2, TN)   running  sum_i feat[set, i, :]^2        (f32)
#   acc_g, acc_r  : (TM, TN)  f32 K-reduction accumulators (VMEM scratch)
# --------------------------------------------------------------------------
def stats_kernel(g_ref, r_ref, w_ref, colsum_ref, sqcol_ref, acc_g, acc_r):
    mb = pl.program_id(1)
    kb = pl.program_id(2)
    nkb = pl.num_programs(2)

    # First (batch, K) step for this output-column block: zero the statistics.
    @pl.when((mb == 0) & (kb == 0))
    def _():
        colsum_ref[...] = jnp.zeros_like(colsum_ref)
        sqcol_ref[...] = jnp.zeros_like(sqcol_ref)

    # New batch tile: zero the K accumulators.
    @pl.when(kb == 0)
    def _():
        acc_g[...] = jnp.zeros_like(acc_g)
        acc_r[...] = jnp.zeros_like(acc_r)

    w = w_ref[...]                       # one W fetch serves both image sets
    acc_g[...] += jnp.dot(g_ref[...], w, preferred_element_type=jnp.float32)
    acc_r[...] += jnp.dot(r_ref[...], w, preferred_element_type=jnp.float32)

    # K reduction done for this (nb, mb): fold into the per-set statistics.
    @pl.when(kb == nkb - 1)
    def _():
        fg = acc_g[...]
        fr = acc_r[...]
        colsum_ref[...] += jnp.concatenate(
            [jnp.sum(fg, axis=0, keepdims=True),
             jnp.sum(fr, axis=0, keepdims=True)], axis=0)
        sqcol_ref[...] += jnp.concatenate(
            [jnp.sum(fg * fg, axis=0, keepdims=True),
             jnp.sum(fr * fr, axis=0, keepdims=True)], axis=0)


def prepare_projection(w_proj, *, tk=2048, tn=512,
                       compute_dtype=jnp.bfloat16):
    """Cast + pad the projection weight ONCE (hoisted out of the call path)."""
    k_in, d = w_proj.shape
    tk = min(tk, _round_up(k_in, 128))
    tn = min(tn, _round_up(d, 128))       # tn<=512 keeps >=4 megacore blocks
    k_pad = _round_up(k_in, tk)
    d_pad = _round_up(d, tn)
    w = w_proj.astype(compute_dtype)
    if (k_pad, d_pad) != (k_in, d):
        # Zero padding is exact: padded rows/cols contribute 0 to every sum.
        w = jnp.pad(w, ((0, k_pad - k_in), (0, d_pad - d)))
    return w, tk, tn


def extract_feature_stats(gen_images, real_images, w_prepped, *, tk, tn,
                          tm=512, compute_dtype=jnp.bfloat16):
    # TODO(synk): the full InceptionV3 backbone has no compact Pallas
    # equivalent here; it is replaced by a deterministic linear projection
    # (C*H*W -> 2048) acting as the 2048-d feature extractor.
    n = gen_images.shape[0]
    k_in = 1
    for s in gen_images.shape[1:]:
        k_in *= s
    k_pad, d_pad = w_prepped.shape

    # bf16 packs 16 rows per sublane group; f32 packs 8.
    sub = 16 if compute_dtype == jnp.bfloat16 else 8
    tm = min(tm, _round_up(n, sub))
    n_pad = _round_up(n, tm)

    def prep(imgs):
        x = imgs.reshape(n, k_in).astype(compute_dtype)
        if n_pad != n or k_pad != k_in:
            x = jnp.pad(x, ((0, n_pad - n), (0, k_pad - k_in)))
        return x

    g = prep(gen_images)
    r = prep(real_images)

    grid = (d_pad // tn, n_pad // tm, k_pad // tk)

    colsum, sqcol = pl.pallas_call(
        stats_kernel,
        out_shape=(jax.ShapeDtypeStruct((2, d_pad), jnp.float32),
                   jax.ShapeDtypeStruct((2, d_pad), jnp.float32)),
        grid=grid,
        in_specs=[
            pl.BlockSpec((tm, tk), lambda nb, mb, kb: (mb, kb)),
            pl.BlockSpec((tm, tk), lambda nb, mb, kb: (mb, kb)),
            pl.BlockSpec((tk, tn), lambda nb, mb, kb: (kb, nb)),
        ],
        out_specs=(
            pl.BlockSpec((2, tn), lambda nb, mb, kb: (0, nb)),
            pl.BlockSpec((2, tn), lambda nb, mb, kb: (0, nb)),
        ),
        scratch_shapes=[pltpu.VMEM((tm, tn), jnp.float32),
                        pltpu.VMEM((tm, tn), jnp.float32)],
        compiler_params=pltpu.CompilerParams(
            dimension_semantics=("parallel", "arbitrary", "arbitrary"),
            # Double-buffered bf16 tiles + two f32 accs fit comfortably in
            # 32 MiB even on v7x (64 MiB physical VMEM per TC).
            vmem_limit_bytes=32 * 1024 * 1024,
        ),
    )(g, r, w_prepped)
    return colsum, sqcol


# --------------------------------------------------------------------------
# Kernel 2: KID score from the sufficient statistics (O(D) work).
#   colsum_ref / sqcol_ref : (2, D) f32 — row 0 = generated, row 1 = real
#   o_ref                  : (1,)   f32 scalar in SMEM, written once
# --------------------------------------------------------------------------
def score_kernel(colsum_ref, sqcol_ref, o_ref, *, n):
    cg = colsum_ref[0:1, :]
    cr = colsum_ref[1:2, :]
    sum_cov1 = jnp.sum(cg * cg)        # sum(G @ G.T)
    sum_cov2 = jnp.sum(cr * cr)        # sum(R @ R.T)
    cross = jnp.sum(cg * cr)           # sum(G @ R.T)
    tr1 = jnp.sum(sqcol_ref[0:1, :])   # trace(G @ G.T)
    tr2 = jnp.sum(sqcol_ref[1:2, :])   # trace(R @ R.T)

    inv_nn1 = 1.0 / (n * (n - 1))
    inv_n2 = 1.0 / (n * n)
    o_ref[0] = (inv_nn1 * (sum_cov1 - tr1)
                + inv_nn1 * (sum_cov2 - tr2)
                - 2.0 * inv_n2 * cross)


def kid_score(colsum, sqcol, n):
    return pl.pallas_call(
        functools.partial(score_kernel, n=n),
        out_shape=jax.ShapeDtypeStruct((1,), jnp.float32),
        in_specs=[
            pl.BlockSpec(memory_space=pltpu.VMEM),
            pl.BlockSpec(memory_space=pltpu.VMEM),
        ],
        out_specs=pl.BlockSpec(memory_space=pltpu.SMEM),
    )(colsum, sqcol)


def kernel_inception_distance(generated_images, real_images, w_prepped, *,
                              tk, tn, tm=512, compute_dtype=jnp.bfloat16):
    assert generated_images.shape == real_images.shape
    n = generated_images.shape[0]
    assert n >= 2, "KID needs at least 2 images (n*(n-1) denominator)"
    colsum, sqcol = extract_feature_stats(
        generated_images, real_images, w_prepped, tk=tk, tn=tn, tm=tm,
        compute_dtype=compute_dtype)
    return kid_score(colsum, sqcol, n)[0]


# --------------------------------------------------------------------------
# Pure-JAX reference (same math as the PyTorch module, Gram-matrix form).
# --------------------------------------------------------------------------
def reference(generated_images, real_images, w_proj):
    n = generated_images.shape[0]
    hp = jax.lax.Precision.HIGHEST
    g = jnp.matmul(generated_images.reshape(n, -1).astype(jnp.float32),
                   w_proj.astype(jnp.float32), precision=hp)
    r = jnp.matmul(real_images.reshape(n, -1).astype(jnp.float32),
                   w_proj.astype(jnp.float32), precision=hp)
    cov1 = jnp.matmul(g, g.T, precision=hp)
    cov2 = jnp.matmul(r, r.T, precision=hp)
    s1 = (jnp.sum(cov1) - jnp.trace(cov1)) / (n * (n - 1))
    s2 = (jnp.sum(cov2) - jnp.trace(cov2)) / (n * (n - 1))
    s3 = jnp.sum(jnp.matmul(g, r.T, precision=hp)) / (n * n)
    return s1 + s2 - 2.0 * s3


if __name__ == "__main__":
    key = jax.random.PRNGKey(0)
    k_gen, k_real, k_w = jax.random.split(key, 3)

    N, C, H, W = 16, 3, 16, 16          # small shapes, N divisible by 8
    gen_images = jax.random.normal(k_gen, (N, C, H, W), dtype=jnp.float32)
    real_images = jax.random.normal(k_real, (N, C, H, W), dtype=jnp.float32)

    # Deterministic stand-in "Inception" projection weights (C*H*W, 2048).
    k_in = C * H * W
    w_proj = (jax.random.normal(k_w, (k_in, FEAT_DIM), dtype=jnp.float32)
              / jnp.sqrt(jnp.float32(k_in)))

    # --- default bf16 compute path -------------------------------------
    w_bf16, tk, tn = prepare_projection(w_proj, compute_dtype=jnp.bfloat16)
    out = kernel_inception_distance(gen_images, real_images, w_bf16,
                                    tk=tk, tn=tn,
                                    compute_dtype=jnp.bfloat16)
    out = jax.block_until_ready(out)

    # Apples-to-apples reference: same bf16 input quantization, f32 math.
    q = lambda a: a.astype(jnp.bfloat16).astype(jnp.float32)
    ref_q = reference(q(gen_images), q(real_images), q(w_proj))
    if not jnp.allclose(out, ref_q, rtol=2e-2, atol=2e-2):
        raise AssertionError(f"bf16 mismatch: pallas={out} ref={ref_q}")

    # --- f32 compute path against the full-precision module reference ---
    w_f32, tk32, tn32 = prepare_projection(w_proj, compute_dtype=jnp.float32)
    out32 = kernel_inception_distance(gen_images, real_images, w_f32,
                                      tk=tk32, tn=tn32,
                                      compute_dtype=jnp.float32)
    out32 = jax.block_until_ready(out32)
    ref = reference(gen_images, real_images, w_proj)
    if not jnp.allclose(out32, ref, rtol=1e-3, atol=1e-2):
        raise AssertionError(f"f32 mismatch: pallas={out32} ref={ref}")

    print("KERNEL_OK")
</pallas_src>

<mosaic_0001>
module attributes {stable_mosaic.version = 11 : i64} {
  func.func @stats_kernel(%arg0: i32, %arg1: i32, %arg2: i32, %arg3: memref<16x768xbf16, #tpu.memory_space<vmem>>, %arg4: memref<16x768xbf16, #tpu.memory_space<vmem>>, %arg5: memref<768x512xbf16, #tpu.memory_space<vmem>>, %arg6: memref<2x512xf32, #tpu.memory_space<vmem>>, %arg7: memref<2x512xf32, #tpu.memory_space<vmem>>, %arg8: memref<16x512xf32, #tpu.memory_space<vmem>>, %arg9: memref<16x512xf32, #tpu.memory_space<vmem>>) attributes {dimension_semantics = [#tpu.dimension_semantics<parallel>, #tpu.dimension_semantics<arbitrary>, #tpu.dimension_semantics<arbitrary>], iteration_bounds = array<i64: 4, 1, 1>, scalar_prefetch = 0 : i64, scratch_operands = 2 : i64, tpu.core_type = #tpu.core_type<tc>, window_params = [{transform_indices = @transform_0, window_bounds = array<i64: 16, 768>}, {transform_indices = @transform_1, window_bounds = array<i64: 16, 768>}, {transform_indices = @transform_2, window_bounds = array<i64: 768, 512>}, {transform_indices = @transform_3, window_bounds = array<i64: 2, 512>}, {transform_indices = @transform_4, window_bounds = array<i64: 2, 512>}]} {
    %c0_i32 = arith.constant 0 : i32
    %0 = arith.cmpi eq, %arg1, %c0_i32 : i32
    %c0_i32_0 = arith.constant 0 : i32
    %1 = arith.cmpi eq, %arg2, %c0_i32_0 : i32
    %2 = arith.andi %0, %1 : i1
    %3 = arith.extui %2 : i1 to i32
    %c0_i32_1 = arith.constant 0 : i32
    %4 = arith.cmpi ne, %3, %c0_i32_1 : i32
    scf.if %4 {
      %cst_20 = arith.constant 0.000000e+00 : f32
      %22 = vector.broadcast %cst_20 : f32 to vector<2x512xf32>
      %c0_21 = arith.constant 0 : index
      %c0_22 = arith.constant 0 : index
      %23 = vector.load %arg6[%c0_21, %c0_22] : memref<2x512xf32, #tpu.memory_space<vmem>>, vector<2x512xf32>
      tpu.vector_store %arg6[%c0_21, %c0_22], %22 {strides = array<i32>} : memref<2x512xf32, #tpu.memory_space<vmem>>, vector<2x512xf32>,
      %cst_23 = arith.constant 0.000000e+00 : f32
      %24 = vector.broadcast %cst_23 : f32 to vector<2x512xf32>
      %c0_24 = arith.constant 0 : index
      %c0_25 = arith.constant 0 : index
      %25 = vector.load %arg7[%c0_24, %c0_25] : memref<2x512xf32, #tpu.memory_space<vmem>>, vector<2x512xf32>
      tpu.vector_store %arg7[%c0_24, %c0_25], %24 {strides = array<i32>} : memref<2x512xf32, #tpu.memory_space<vmem>>, vector<2x512xf32>,
    } else {
    }
    %c0_i32_2 = arith.constant 0 : i32
    %5 = arith.cmpi eq, %arg2, %c0_i32_2 : i32
    %6 = arith.extui %5 : i1 to i32
    %c0_i32_3 = arith.constant 0 : i32
    %7 = arith.cmpi ne, %6, %c0_i32_3 : i32
    scf.if %7 {
      %cst_20 = arith.constant 0.000000e+00 : f32
      %22 = vector.broadcast %cst_20 : f32 to vector<16x512xf32>
      %c0_21 = arith.constant 0 : index
      %c0_22 = arith.constant 0 : index
      %23 = vector.load %arg8[%c0_21, %c0_22] : memref<16x512xf32, #tpu.memory_space<vmem>>, vector<16x512xf32>
      tpu.vector_store %arg8[%c0_21, %c0_22], %22 {strides = array<i32>} : memref<16x512xf32, #tpu.memory_space<vmem>>, vector<16x512xf32>,
      %cst_23 = arith.constant 0.000000e+00 : f32
      %24 = vector.broadcast %cst_23 : f32 to vector<16x512xf32>
      %c0_24 = arith.constant 0 : index
      %c0_25 = arith.constant 0 : index
      %25 = vector.load %arg9[%c0_24, %c0_25] : memref<16x512xf32, #tpu.memory_space<vmem>>, vector<16x512xf32>
      tpu.vector_store %arg9[%c0_24, %c0_25], %24 {strides = array<i32>} : memref<16x512xf32, #tpu.memory_space<vmem>>, vector<16x512xf32>,
    } else {
    }
    %c0 = arith.constant 0 : index
    %c0_4 = arith.constant 0 : index
    %8 = vector.load %arg5[%c0, %c0_4] : memref<768x512xbf16, #tpu.memory_space<vmem>>, vector<768x512xbf16>
    %c0_5 = arith.constant 0 : index
    %c0_6 = arith.constant 0 : index
    %9 = vector.load %arg8[%c0_5, %c0_6] : memref<16x512xf32, #tpu.memory_space<vmem>>, vector<16x512xf32>
    %c0_7 = arith.constant 0 : index
    %c0_8 = arith.constant 0 : index
    %10 = vector.load %arg3[%c0_7, %c0_8] : memref<16x768xbf16, #tpu.memory_space<vmem>>, vector<16x768xbf16>
    %cst = arith.constant dense<0.000000e+00> : vector<16x512xf32>
    %11 = tpu.matmul %10, %8, %cst {dimension_numbers = #tpu.dot_dimension_numbers<[1], [0], [0], [1], [0, 0, 1, 1], [], []>} : vector<16x768xbf16>, vector<768x512xbf16>, vector<16x512xf32> -> vector<16x512xf32>
    %12 = arith.addf %9, %11 : vector<16x512xf32>
    %c0_9 = arith.constant 0 : index
    %c0_10 = arith.constant 0 : index
    %13 = vector.load %arg8[%c0_9, %c0_10] : memref<16x512xf32, #tpu.memory_space<vmem>>, vector<16x512xf32>
    tpu.vector_store %arg8[%c0_9, %c0_10], %12 {strides = array<i32>} : memref<16x512xf32, #tpu.memory_space<vmem>>, vector<16x512xf32>,
    %c0_11 = arith.constant 0 : index
    %c0_12 = arith.constant 0 : index
    %14 = vector.load %arg9[%c0_11, %c0_12] : memref<16x512xf32, #tpu.memory_space<vmem>>, vector<16x512xf32>
    %c0_13 = arith.constant 0 : index
    %c0_14 = arith.constant 0 : index
    %15 = vector.load %arg4[%c0_13, %c0_14] : memref<16x768xbf16, #tpu.memory_space<vmem>>, vector<16x768xbf16>
    %cst_15 = arith.constant dense<0.000000e+00> : vector<16x512xf32>
    %16 = tpu.matmul %15, %8, %cst_15 {dimension_numbers = #tpu.dot_dimension_numbers<[1], [0], [0], [1], [0, 0, 1, 1], [], []>} : vector<16x768xbf16>, vector<768x512xbf16>, vector<16x512xf32> -> vector<16x512xf32>
    %17 = arith.addf %14, %16 : vector<16x512xf32>
    %c0_16 = arith.constant 0 : index
    %c0_17 = arith.constant 0 : index
    %18 = vector.load %arg9[%c0_16, %c0_17] : memref<16x512xf32, #tpu.memory_space<vmem>>, vector<16x512xf32>
    tpu.vector_store %arg9[%c0_16, %c0_17], %17 {strides = array<i32>} : memref<16x512xf32, #tpu.memory_space<vmem>>, vector<16x512xf32>,
    %c0_i32_18 = arith.constant 0 : i32
    %19 = arith.cmpi eq, %arg2, %c0_i32_18 : i32
    %20 = arith.extui %19 : i1 to i32
    %c0_i32_19 = arith.constant 0 : i32
    %21 = arith.cmpi ne, %20, %c0_i32_19 : i32
    scf.if %21 {
      %c0_20 = arith.constant 0 : index
      %c0_21 = arith.constant 0 : index
      %22 = vector.load %arg8[%c0_20, %c0_21] : memref<16x512xf32, #tpu.memory_space<vmem>>, vector<16x512xf32>
      %c0_22 = arith.constant 0 : index
      %c0_23 = arith.constant 0 : index
      %23 = vector.load %arg9[%c0_22, %c0_23] : memref<16x512xf32, #tpu.memory_space<vmem>>, vector<16x512xf32>
      %c0_24 = arith.constant 0 : index
      %c0_25 = arith.constant 0 : index
      %24 = vector.load %arg6[%c0_24, %c0_25] : memref<2x512xf32, #tpu.memory_space<vmem>>, vector<2x512xf32>
      %cst_26 = arith.constant dense<0.000000e+00> : vector<512xf32>
      %25 = vector.multi_reduction <add>, %22, %cst_26 [0] : vector<16x512xf32> to vector<512xf32>
      %26 = vector.shape_cast %25 : vector<512xf32> to vector<1x512xf32>
      %cst_27 = arith.constant dense<0.000000e+00> : vector<512xf32>
      %27 = vector.multi_reduction <add>, %23, %cst_27 [0] : vector<16x512xf32> to vector<512xf32>
      %28 = vector.shape_cast %27 : vector<512xf32> to vector<1x512xf32>
      %29 = tpu.concatenate %26, %28 in 0 : vector<1x512xf32>, vector<1x512xf32> -> vector<2x512xf32>
      %30 = arith.addf %24, %29 : vector<2x512xf32>
      %c0_28 = arith.constant 0 : index
      %c0_29 = arith.constant 0 : index
      %31 = vector.load %arg6[%c0_28, %c0_29] : memref<2x512xf32, #tpu.memory_space<vmem>>, vector<2x512xf32>
      tpu.vector_store %arg6[%c0_28, %c0_29], %30 {strides = array<i32>} : memref<2x512xf32, #tpu.memory_space<vmem>>, vector<2x512xf32>,
      %c0_30 = arith.constant 0 : index
      %c0_31 = arith.constant 0 : index
      %32 = vector.load %arg7[%c0_30, %c0_31] : memref<2x512xf32, #tpu.memory_space<vmem>>, vector<2x512xf32>
      %33 = arith.mulf %22, %22 : vector<16x512xf32>
      %cst_32 = arith.constant dense<0.000000e+00> : vector<512xf32>
      %34 = vector.multi_reduction <add>, %33, %cst_32 [0] : vector<16x512xf32> to vector<512xf32>
      %35 = vector.shape_cast %34 : vector<512xf32> to vector<1x512xf32>
      %36 = arith.mulf %23, %23 : vector<16x512xf32>
      %cst_33 = arith.constant dense<0.000000e+00> : vector<512xf32>
      %37 = vector.multi_reduction <add>, %36, %cst_33 [0] : vector<16x512xf32> to vector<512xf32>
      %38 = vector.shape_cast %37 : vector<512xf32> to vector<1x512xf32>
      %39 = tpu.concatenate %35, %38 in 0 : vector<1x512xf32>, vector<1x512xf32> -> vector<2x512xf32>
      %40 = arith.addf %32, %39 : vector<2x512xf32>
      %c0_34 = arith.constant 0 : index
      %c0_35 = arith.constant 0 : index
      %41 = vector.load %arg7[%c0_34, %c0_35] : memref<2x512xf32, #tpu.memory_space<vmem>>, vector<2x512xf32>
      tpu.vector_store %arg7[%c0_34, %c0_35], %40 {strides = array<i32>} : memref<2x512xf32, #tpu.memory_space<vmem>>, vector<2x512xf32>,
    } else {
    }
    return
  }
  func.func @transform_0(%arg0: i32, %arg1: i32, %arg2: i32) -> (i32, i32) {
    %c0_i32 = arith.constant 0 : i32
    return %arg1, %arg2 : i32, i32
  }
  func.func @transform_1(%arg0: i32, %arg1: i32, %arg2: i32) -> (i32, i32) {
    %c0_i32 = arith.constant 0 : i32
    return %arg1, %arg2 : i32, i32
  }
  func.func @transform_2(%arg0: i32, %arg1: i32, %arg2: i32) -> (i32, i32) {
    %c0_i32 = arith.constant 0 : i32
    return %arg2, %arg0 : i32, i32
  }
  func.func @transform_3(%arg0: i32, %arg1: i32, %arg2: i32) -> (i32, i32) {
    %c0_i32 = arith.constant 0 : i32
    %c0_i32_0 = arith.constant 0 : i32
    return %c0_i32, %arg0 : i32, i32
  }
  func.func @transform_4(%arg0: i32, %arg1: i32, %arg2: i32) -> (i32, i32) {
    %c0_i32 = arith.constant 0 : i32
    %c0_i32_0 = arith.constant 0 : i32
    return %c0_i32, %arg0 : i32, i32
  }
}

</mosaic_0001>

<bundles_post_ra>
// kernel: tpu_custom_call.1
= control target key start
LH: loop header
LB: loop body
LE: loop exit
PB: predicated region body
PF: predicated region fallthrough
CT: control target
= control target key end

     0   :  { %10 = vsyncpa [#allocation5], 0  ;;  %s4627_s0 = inlined_call_operand.hbm [shape: bf16[16,768], index: 0, kind: input, shape index: {}]   ;;  %s4628_s1 = inlined_call_operand.hbm [shape: bf16[16,768], index: 1, kind: input, shape index: {}]   ;;  %s4629_s2 = inlined_call_operand.hbm [shape: bf16[768,2048], index: 2, kind: input, shape index: {}]   ;;  %s4630_s3 = inlined_call_operand.hbm [shape: f32[2,2048], index: 3, kind: output, shape index: {0}]   ;;  %s4631_s4 = inlined_call_operand.hbm [shape: f32[2,2048], index: 4, kind: output, shape index: {1}]  }
   0x1   :  { %11 = vsyncpa [#allocation8], 0 }
   0x2   :  { %12 = vsyncpa [#allocation6], 0 }
   0x3   :  { %14 = vsyncpa [#allocation6 + $0x1], 0 }
   0x4   :  { %15 = vsyncpa [#allocation12], 0 }
   0x5   :  { %17 = vsyncpa [#allocation12 + $0x1], 0  ;;  %s3463_s15 = smov 0   ;;  %s3465_s16 = smov 0  }
   0x6   :  { %s3467_s17 = smov 0   ;;  %s3469_s18 = smov 0  }
   0x7   :  { %s3471_s19 = smov 0   ;;  %s3473_s20 = smov 0  }
   0x8 LB: > { %s3494_s21 = sadd.s32 4294967295, %s3425_s20   ;;  %s2513_s22 = sadd.s32 4294967294, %s3425_s20   ;;  %s3425_s20 = sphi %s3473_s20, %s23_s20   ;;  %s3421_s19 = sphi %s3471_s19, %s4942_s19   ;;  %s3417_s18 = sphi %s3469_s18, %s4941_s18   ;;  %s3413_s17 = sphi %s3467_s17, %s4940_s17   ;;  %s3409_s16 = sphi %s3465_s16, %s4939_s16   ;;  %s3405_s15 = sphi %s3463_s15, %s4938_s15  }
   0x9   : > { %p114_p0 = scmp.ne.s32.totalorder %s3413_s17, %s3409_s16  ;;  %p115_p1 = scmp.eq.s32.totalorder %s3425_s20, 0 }
   0xa   : > { %p120_p2 = scmp.ne.s32.totalorder %s3409_s16, %s3405_s15  ;;  %p4632_p3 = scmp.eq.s32.totalorder %s3494_s21, 0 }
   0xb   : > { %p144_p4 = scmp.eq.s32.totalorder %s3494_s21, 3  ;;  %p3505_p5 = por %p115_p1, %p114_p0 }
   0xc   : > { %p150_p6 = scmp.eq.s32.totalorder %s2513_s22, 3  ;;  %p3511_p7 = por %p4632_p3, %p120_p2 }
   0xd   : > { %p3515_p8 = por %p144_p4, %p114_p0  ;;  %p2514_p10 = scmp.ge.s32.totalorder %s3425_s20, 1 }
   0xe   : > { %s4732_s25 = scalar_select %p3511_p7, 1, 0 }
   0xf   : > { %s4733_s26 = scalar_select %p3515_p8, 1, 0 }
  0x10   : > { %p3519_p9 = por %p150_p6, %p120_p2  ;;  %p183_p11 = scmp.lt.s32.totalorder %s3425_s20, 5 }
  0x11   : > { %s3427_s29 = smov [#allocation4]   ;;  %p2808_p0 = scmp.lt.s32.totalorder %s3425_s20, 4 }
  0x12   : > { %s4734_s27 = scalar_select %p3519_p9, 1, 0 }
  0x13   : > { %p3525_p12 = pnand %p2514_p10, %p183_p11  ;;  %s201_s30 = sshll.u32 %s3427_s29, 4  ;;  %s3529_s30 = int_to_ptr.vmem [resolvable:$true] %s201_s30 }
  0x14   : > { %s3428_s6 = smov [#allocation7]   ;;  %p3542_p2 = pnand %p2808_p0, %p3505_p5 }
  0x15   : > { %p2788_p13 = pneg %p3525_p12  ;;  %s220_s7 = sshll.u32 %s3428_s6, 4  ;;  %s3546_s7 = int_to_ptr.vmem [resolvable:$true] %s220_s7 }
  0x16   : > { %s3217_s11 = scalar_lea.hbm %s4627_s0, 768 }
  0x17   : > { %p3536_p1 = pnand %p2788_p13, %p4632_p3  ;;  %p3218_p4 = scmp.ne.s32.totalorder %s4627_s0, %s3217_s11 }
  0x18   : > { %p3224_p5 = scmp.lt.u32.totalorder %s3217_s11, %s4627_s0 }
  0x19   : > { %p3219_p6 = pneg %p3536_p1 }
  0x1b   : > { %p3220_p10 = pnand %p3219_p6, %p3218_p4 }
  0x1d   : > { %p3221_p11 = pneg %p3220_p10 }
  0x1f   : > { %p3226_p13 = pnand %p3224_p5, %p3221_p11 }
  0x21   : > { %3229 = shalt.err (!%p3226_p13)
}
  0x22   : > { %s3230_s24 = scalar_lea.vmem %s3529_s30, 768  ;;  %p3238_p8 = scmp.lt.s32.totalorder %s3529_s30, %s3529_s30 }
  0x23   : > { %p3231_p0 = scmp.ne.s32.totalorder %s3529_s30, %s3230_s24  ;;  %p3239_p4 = scmp.lt.s32.totalorder %s3230_s24, %s3230_s24 }
  0x25   : > { %p3233_p3 = pnand %p3231_p0, %p3219_p6  ;;  %p3240_p10 = por %p3239_p4, %p3238_p8 }
  0x27   : > { %p3234_p9 = pneg %p3233_p3 }
  0x29   : > { %p3241_p7 = pnand %p3240_p10, %p3234_p9 }
  0x2b   : > { %3244 = shalt.err (!%p3241_p7)
}
  0x2c   : > { %s3429_s29 = smov 384   ;;  %s3430_s6 = smov 24  }
  0x2d   : > { %2791 = dma.hbm_to_vmem [thread:$0]  (!%p3536_p1), %s4627_s0, 768, %s3529_s30, [#allocation5], %s3429_s29, %s3429_s29, %s3430_s6  }
  0x2e   : > { %s3245_s13 = scalar_lea.hbm %s4628_s1, 768 }
  0x2f   : > { %p3246_p3 = scmp.ne.s32.totalorder %s4628_s1, %s3245_s13  ;;  %p3252_p9 = scmp.lt.u32.totalorder %s3245_s13, %s4628_s1 }
  0x31   : > { %p3248_p7 = pnand %p3246_p3, %p3219_p6 }
  0x33   : > { %p3249_p8 = pneg %p3248_p7 }
  0x35   : > { %p3254_p11 = pnand %p3252_p9, %p3249_p8 }
  0x37   : > { %3257 = shalt.err (!%p3254_p11)
}
  0x38   : > { %s3258_s30 = scalar_lea.vmem %s3546_s7, 768  ;;  %p3266_p4 = scmp.lt.s32.totalorder %s3546_s7, %s3546_s7 }
  0x39   : > { %p3259_p5 = scmp.ne.s32.totalorder %s3546_s7, %s3258_s30  ;;  %p3267_p10 = scmp.lt.s32.totalorder %s3258_s30, %s3258_s30 }
  0x3b   : > { %p3261_p13 = pnand %p3259_p5, %p3219_p6  ;;  %p3268_p3 = por %p3267_p10, %p3266_p4 }
  0x3d   : > { %p3262_p0 = pneg %p3261_p13 }
  0x3f   : > { %p3269_p7 = pnand %p3268_p3, %p3262_p0 }
  0x41   : > { %3272 = shalt.err (!%p3269_p7)
}
  0x42   : > { %2794 = dma.hbm_to_vmem [thread:$0]  (!%p3536_p1), %s4628_s1, 768, %s3546_s7, [#allocation8], %s3429_s29, %s3429_s29, %s3430_s6  }
  0x43   : > { %s42_s10 = sadd.s32 1, %s3421_s19  ;;  %s234_s11 = sand.u32 1, %s3425_s20  }
  0x44   : > { %p44_p6 = scmp.ge.s32.totalorder %s42_s10, 4  ;;  %s236_s12 = sand.u32 1, %s3413_s17  }
  0x45   : > { %s2737_s13 = sshll.u32 %s3421_s19, 8  ;;  %s2772_s5 = smul.u32 1536, %s236_s12 }
  0x46   : > { %s4944_s10 = smov (%p44_p6, %s42_s10), 0  ;;  %s3609_s24 = scalar_lea.hbm %s4629_s2, %s2737_s13 }
  0x47   : > { %s103_s7 = ssub.s32 %s3421_s19, %s4944_s10  ;;  %s238_s29 = scalar_lea.vmem [#allocation9], %s2772_s5 }
  0x48   : > { %p105_p1 = scmp.eq.s32.totalorder %s103_s7, 0  ;;  %s248_s6 = sshll.u32 %s238_s29, 4  ;;  %s3618_s6 = int_to_ptr.vmem [resolvable:$true] %s248_s6 }
  0x49   : > { %s4738_s30 = sadd.s32 1, %s3413_s17  ;;  %s3620_s9 = scalar_lea.sflag [#allocation5], %s234_s11 }
  0x4a   : > { %s3616_s23 = scalar_select %p105_p1, %s3413_s17, %s4738_s30  }
  0x4b   : > { %s3273_s12 = scalar_lea.hbm %s3609_s24, 24576  ;;  %p3275_p9 = pneg %p3542_p2 }
  0x4c   : > { %p3274_p8 = scmp.ne.s32.totalorder %s3609_s24, %s3273_s12  ;;  %s3278_s5 = scalar_lea.hbm %s4629_s2, 98304 }
  0x4d   : > { %p3279_p13 = scmp.lt.u32.totalorder %s3609_s24, %s4629_s2  ;;  %p3280_p0 = scmp.lt.u32.totalorder %s3278_s5, %s3273_s12 }
  0x4e   : > { %p3276_p11 = pnand %p3275_p9, %p3274_p8  ;;  %p3282_p10 = scmp.lt.u32.totalorder %s3273_s12, %s3609_s24 }
  0x4f   : > { %p3281_p4 = por %p3280_p0, %p3279_p13 }
  0x50   : > { %p3277_p5 = pneg %p3276_p11 }
  0x51   : > { %p3283_p3 = por %p3282_p10, %p3281_p4 }
  0x53   : > { %p3284_p7 = pnand %p3283_p3, %p3277_p5 }
  0x55   : > { %3287 = shalt.err (!%p3284_p7)
}
  0x56   : > { %s3288_s11 = scalar_lea.vmem %s3618_s6, 24576  ;;  %s3431_s29 = smov [#allocation9]  }
  0x57   : > { %p3289_p6 = scmp.ne.s32.totalorder %s3618_s6, %s3288_s11  ;;  %s3293_s30 = sshll.u32 %s3431_s29, 4  ;;  %s3294_s30 = int_to_ptr.vmem [resolvable:$false] %s3293_s30 }
  0x58   : > { %s3295_s13 = scalar_lea.vmem %s3294_s30, 49152  ;;  %p3296_p11 = scmp.lt.s32.totalorder %s3618_s6, %s3294_s30 }
  0x59   : > { %p3291_p1 = pnand %p3289_p6, %p3275_p9  ;;  %p3297_p13 = scmp.lt.s32.totalorder %s3295_s13, %s3288_s11 }
  0x5b   : > { %p3292_p8 = pneg %p3291_p1  ;;  %p3298_p0 = por %p3297_p13, %p3296_p11 }
  0x5d   : > { %p3299_p4 = pnand %p3298_p0, %p3292_p8 }
  0x5f   : > { %3302 = shalt.err (!%p3299_p4)
}
  0x60   : > { %s3432_s12 = smov 1024   ;;  %s3433_s14 = smov 256  }
  0x61   : > { %s3434_s5 = smov 16   ;;  %260 = sbr.rel (%p3525_p12) target bundleno = 774 (0x306), region = 32 }
  0x62   : > { %2798 = dma.hbm_to_vmem [thread:$0]  (!%p3542_p2), %s3609_s24, 24576, %s3618_s6, %s3620_s9, %s3432_s12, %s3433_s14, %s3434_s5  }
  0x68   : > { %p4739_p9 = scmp.eq.s32.totalorder %s3494_s21, 0 }
  0x6a   : > { %3384 = dma.done.wait (%p4739_p9), [#allocation5], 768   ;;  %p4740_p5 = pmov %p4739_p9 }
  0x6c   : > { %3386 = vsyncadd (%p4740_p5), [#allocation5], 4294966528  ;;  %p4741_p10 = pmov %p4740_p5 }
  0x6d   : > { %p4742_p3 = pmov %p4740_p5 }
  0x6e   : > { %3388 = dma.done.wait (%p4741_p10), [#allocation8], 768  }
  0x6f   : > { %3390 = vsyncadd (%p4742_p3), [#allocation8], 4294966528  ;;  %s270_s8 = sand.u32 1, %s3494_s21   ;;  %s3660_s24 = sand.u32 1, %s3409_s16  }
  0x70   : > { %s2773_s28 = smul.u32 1536, %s3660_s24  ;;  %s271_s6 = scalar_lea.sflag [#allocation5], %s270_s8 }
  0x71   : > { %p4743_p12 = scmp.ne.s32.totalorder %s4732_s25, 0 }
  0x72   : > { %s3663_s9 = scalar_lea.vmem [#allocation9], %s2773_s28 }
  0x73   : > { %3392 = dma.done.wait (%p4743_p12), %s271_s6, 24576  }
  0x74   : > { %3394 = vsyncadd (%p4743_p12), %s271_s6, 4294942720  ;;  %v2869_v0 = vld [vmem:[%s3663_s9 + $0x4] ss:$16 sps:$4 sm:$0xff]   ;;  %v2871_v1 = vld [vmem:[%s3663_s9 + $0xc] ss:$16 sps:$4 sm:$0xff]   ;;  %vm2203_vm0 = vcmask 1040384  }
  0x75   : > { %1535 = vmatprep.subr.bf16.mxu0 %v2869_v0  ;;  %v2873_v2 = vld [vmem:[%s3663_s9] ss:$16 sps:$4 sm:$0xff]   ;;  %v2874_v3 = vld [vmem:[%s3663_s9 + $0x8] ss:$16 sps:$4 sm:$0xff]   ;;  %1664 = vmatprep.subr.bf16.mxu1 %v2871_v1  ;;  %v2875_v4 = vld [vmem:[%s3663_s9 + $0x24] ss:$16 sps:$4 sm:$0xff]  }
  0x76   : > { %1536 = vmatpush1.bf16.msra.mxu0 %v2873_v2  ;;  %1665 = vmatpush1.bf16.msra.mxu1 %v2874_v3  ;;  %v2877_v5 = vld [vmem:[%s3663_s9 + $0x2c] ss:$16 sps:$4 sm:$0xff]   ;;  %v2879_v6 = vld [vmem:[%s3663_s9 + $0x20] ss:$16 sps:$4 sm:$0xff]   ;;  %v2880_v7 = vld [vmem:[%s3663_s9 + $0x28] ss:$16 sps:$4 sm:$0xff]  }
  0x77   : > { %1537 = vmatprep.subr.bf16.mxu0 %v2875_v4  ;;  %1666 = vmatprep.subr.bf16.mxu1 %v2877_v5  ;;  %v2881_v8 = vld [vmem:[%s3663_s9 + $0x44] ss:$16 sps:$4 sm:$0xff]   ;;  %v2883_v9 = vld [vmem:[%s3663_s9 + $0x4c] ss:$16 sps:$4 sm:$0xff]   ;;  %v2885_v10 = vld [vmem:[%s3663_s9 + $0x40] ss:$16 sps:$4 sm:$0xff]  }
  0x78   : > { %v2886_v11 = vld [vmem:[%s3663_s9 + $0x48] ss:$16 sps:$4 sm:$0xff]   ;;  %v2887_v12 = vld [vmem:[%s3663_s9 + $0x64] ss:$16 sps:$4 sm:$0xff]   ;;  %v2889_v13 = vld [vmem:[%s3663_s9 + $0x6c] ss:$16 sps:$4 sm:$0xff]  }
  0x79   : > { %v2891_v14 = vld [vmem:[%s3663_s9 + $0x60] ss:$16 sps:$4 sm:$0xff]   ;;  %v2892_v15 = vld [vmem:[%s3663_s9 + $0x68] ss:$16 sps:$4 sm:$0xff]   ;;  %v2893_v16 = vld [vmem:[%s3663_s9 + $0x84] ss:$16 sps:$4 sm:$0xff]  }
  0x7a   : > { %1538 = vmatpush1.bf16.msra.mxu0 %v2879_v6  ;;  %1667 = vmatpush1.bf16.msra.mxu1 %v2880_v7  ;;  %v2895_v17 = vld [vmem:[%s3663_s9 + $0x8c] ss:$16 sps:$4 sm:$0xff]   ;;  %v2897_v18 = vld [vmem:[%s3663_s9 + $0x80] ss:$16 sps:$4 sm:$0xff]   ;;  %v2898_v19 = vld [vmem:[%s3663_s9 + $0x88] ss:$16 sps:$4 sm:$0xff]  }
  0x7b   : > { %1539 = vmatprep.subr.bf16.mxu0 %v2881_v8  ;;  %1668 = vmatprep.subr.bf16.mxu1 %v2883_v9  ;;  %v2899_v20 = vld [vmem:[%s3663_s9 + $0xa4] ss:$16 sps:$4 sm:$0xff]   ;;  %v2901_v21 = vld [vmem:[%s3663_s9 + $0xac] ss:$16 sps:$4 sm:$0xff]   ;;  %v2903_v22 = vld [vmem:[%s3663_s9 + $0xa0] ss:$16 sps:$4 sm:$0xff]  }
  0x7c   : > { %v2904_v23 = vld [vmem:[%s3663_s9 + $0xa8] ss:$16 sps:$4 sm:$0xff]   ;;  %v2905_v24 = vld [vmem:[%s3663_s9 + $0xc4] ss:$16 sps:$4 sm:$0xff]   ;;  %v2907_v25 = vld [vmem:[%s3663_s9 + $0xcc] ss:$16 sps:$4 sm:$0xff]  }
  0x7d   : > { %v2909_v26 = vld [vmem:[%s3663_s9 + $0xc0] ss:$16 sps:$4 sm:$0xff]   ;;  %v2910_v27 = vld [vmem:[%s3663_s9 + $0xc8] ss:$16 sps:$4 sm:$0xff]   ;;  %v2911_v28 = vld [vmem:[%s3663_s9 + $0xe4] ss:$16 sps:$4 sm:$0xff]  }
  0x7e   : > { %1540 = vmatpush1.bf16.msra.mxu0 %v2885_v10  ;;  %1669 = vmatpush1.bf16.msra.mxu1 %v2886_v11  ;;  %v2913_v29 = vld [vmem:[%s3663_s9 + $0xec] ss:$16 sps:$4 sm:$0xff]   ;;  %v2915_v30 = vld [vmem:[%s3663_s9 + $0xe0] ss:$16 sps:$4 sm:$0xff]   ;;  %v2916_v31 = vld [vmem:[%s3663_s9 + $0xe8] ss:$16 sps:$4 sm:$0xff]  }
  0x7f   : > { %1541 = vmatprep.subr.bf16.mxu0 %v2887_v12  ;;  %1670 = vmatprep.subr.bf16.mxu1 %v2889_v13  ;;  %v2917_v32 = vld [vmem:[%s3663_s9 + $0x104] ss:$16 sps:$4 sm:$0xff]   ;;  %v2919_v33 = vld [vmem:[%s3663_s9 + $0x10c] ss:$16 sps:$4 sm:$0xff]   ;;  %v2921_v34 = vld [vmem:[%s3663_s9 + $0x100] ss:$16 sps:$4 sm:$0xff]  }
  0x80   : > { %v2922_v35 = vld [vmem:[%s3663_s9 + $0x108] ss:$16 sps:$4 sm:$0xff]   ;;  %v2923_v36 = vld [vmem:[%s3663_s9 + $0x124] ss:$16 sps:$4 sm:$0xff]   ;;  %v2925_v37 = vld [vmem:[%s3663_s9 + $0x12c] ss:$16 sps:$4 sm:$0xff]  }
  0x81   : > { %v2927_v38 = vld [vmem:[%s3663_s9 + $0x120] ss:$16 sps:$4 sm:$0xff]   ;;  %v2928_v39 = vld [vmem:[%s3663_s9 + $0x128] ss:$16 sps:$4 sm:$0xff]   ;;  %v2929_v40 = vld [vmem:[%s3663_s9 + $0x144] ss:$16 sps:$4 sm:$0xff]  }
  0x82   : > { %1542 = vmatpush1.bf16.msra.mxu0 %v2891_v14  ;;  %1671 = vmatpush1.bf16.msra.mxu1 %v2892_v15  ;;  %v2931_v41 = vld [vmem:[%s3663_s9 + $0x14c] ss:$16 sps:$4 sm:$0xff]   ;;  %v3712_v42 = vld [vmem:[%s3663_s9 + $0x140] ss:$16 sps:$4 sm:$0xff]   ;;  %v3715_v43 = vld [vmem:[%s3663_s9 + $0x148] ss:$16 sps:$4 sm:$0xff]  }
  0x83   : > { %1543 = vmatprep.subr.bf16.mxu0 %v2893_v16  ;;  %1672 = vmatprep.subr.bf16.mxu1 %v2895_v17  ;;  %v3718_v44 = vld [vmem:[%s3663_s9 + $0x164] ss:$16 sps:$4 sm:$0xff]   ;;  %v3721_v45 = vld [vmem:[%s3663_s9 + $0x16c] ss:$16 sps:$4 sm:$0xff]   ;;  %v3724_v46 = vld [vmem:[%s3663_s9 + $0x160] ss:$16 sps:$4 sm:$0xff]  }
  0x84   : > { %v3727_v47 = vld [vmem:[%s3663_s9 + $0x168] ss:$16 sps:$4 sm:$0xff]   ;;  %v2967_v48 = vld [vmem:[#allocation4 + $0x4] ss:$24 sps:$4 sm:$0xff]   ;;  %v3740_v51 = vld [vmem:[%s3663_s9 + $0x180] ss:$16 sps:$4 sm:$0xff]  }
  0x85   : > { %v3732_v49 = vld [vmem:[%s3663_s9 + $0x184] ss:$16 sps:$4 sm:$0xff]   ;;  %v3737_v50 = vld [vmem:[%s3663_s9 + $0x18c] ss:$16 sps:$4 sm:$0xff]   ;;  %1567 = vmatprep.mubr.bf16.mxu0 %v2967_v48  ;;  %1696 = vmatprep.mubr.bf16.mxu1 %v2967_v48  ;;  %v3743_v52 = vld [vmem:[%s3663_s9 + $0x188] ss:$16 sps:$4 sm:$0xff]  }
  0x86   : > { %1544 = vmatpush1.bf16.msra.mxu0 %v2897_v18  ;;  %1673 = vmatpush1.bf16.msra.mxu1 %v2898_v19  ;;  %v3748_v53 = vld [vmem:[%s3663_s9 + $0x1a4] ss:$16 sps:$4 sm:$0xff]   ;;  %v3753_v54 = vld [vmem:[%s3663_s9 + $0x1ac] ss:$16 sps:$4 sm:$0xff]   ;;  %v3756_v55 = vld [vmem:[%s3663_s9 + $0x1a0] ss:$16 sps:$4 sm:$0xff]  }
  0x87   : > { %1545 = vmatprep.subr.bf16.mxu0 %v2899_v20  ;;  %1674 = vmatprep.subr.bf16.mxu1 %v2901_v21  ;;  %v3759_v56 = vld [vmem:[%s3663_s9 + $0x1a8] ss:$16 sps:$4 sm:$0xff]   ;;  %v3764_v57 = vld [vmem:[%s3663_s9 + $0x1c4] ss:$16 sps:$4 sm:$0xff]   ;;  %v3769_v58 = vld [vmem:[%s3663_s9 + $0x1cc] ss:$16 sps:$4 sm:$0xff]  }
  0x88   : > { %v3772_v59 = vld [vmem:[%s3663_s9 + $0x1c0] ss:$16 sps:$4 sm:$0xff]   ;;  %v3775_v60 = vld [vmem:[%s3663_s9 + $0x1c8] ss:$16 sps:$4 sm:$0xff]   ;;  %v3780_v61 = vld [vmem:[%s3663_s9 + $0x1e4] ss:$16 sps:$4 sm:$0xff]  }
  0x89   : > { %v3785_v62 = vld [vmem:[%s3663_s9 + $0x1ec] ss:$16 sps:$4 sm:$0xff]   ;;  %v3788_v63 = vld [vmem:[%s3663_s9 + $0x1e0] ss:$16 sps:$4 sm:$0xff]   ;;  %v3791_v0 = vld [vmem:[%s3663_s9 + $0x1e8] ss:$16 sps:$4 sm:$0xff]  }
  0x8a   : > { %1546 = vmatpush1.bf16.msra.mxu0 %v2903_v22  ;;  %1675 = vmatpush1.bf16.msra.mxu1 %v2904_v23  ;;  %v3796_v1 = vld [vmem:[%s3663_s9 + $0x204] ss:$16 sps:$4 sm:$0xff]   ;;  %v3801_v2 = vld [vmem:[%s3663_s9 + $0x20c] ss:$16 sps:$4 sm:$0xff]   ;;  %v2965_v3 = vld [vmem:[#allocation4] ss:$24 sps:$4 sm:$0xff]  }
  0x8b   : > { %1547 = vmatprep.subr.bf16.mxu0 %v2905_v24  ;;  %1676 = vmatprep.subr.bf16.mxu1 %v2907_v25  ;;  %v3804_v4 = vld [vmem:[%s3663_s9 + $0x200] ss:$16 sps:$4 sm:$0xff]   ;;  %v3807_v5 = vld [vmem:[%s3663_s9 + $0x208] ss:$16 sps:$4 sm:$0xff]   ;;  %v3812_v6 = vld [vmem:[%s3663_s9 + $0x224] ss:$16 sps:$4 sm:$0xff]  }
  0x8c   : > { %v3817_v7 = vld [vmem:[%s3663_s9 + $0x22c] ss:$16 sps:$4 sm:$0xff]   ;;  %v3820_v8 = vld [vmem:[%s3663_s9 + $0x220] ss:$16 sps:$4 sm:$0xff]   ;;  %v3823_v9 = vld [vmem:[%s3663_s9 + $0x228] ss:$16 sps:$4 sm:$0xff]  }
  0x8d   : > { %v3828_v10 = vld [vmem:[%s3663_s9 + $0x244] ss:$16 sps:$4 sm:$0xff]   ;;  %v3833_v11 = vld [vmem:[%s3663_s9 + $0x24c] ss:$16 sps:$4 sm:$0xff]   ;;  %v3836_v12 = vld [vmem:[%s3663_s9 + $0x240] ss:$16 sps:$4 sm:$0xff]  }
  0x8e   : > { %1548 = vmatpush1.bf16.msra.mxu0 %v2909_v26  ;;  %1677 = vmatpush1.bf16.msra.mxu1 %v2910_v27  ;;  %v3839_v13 = vld [vmem:[%s3663_s9 + $0x248] ss:$16 sps:$4 sm:$0xff]   ;;  %v3844_v14 = vld [vmem:[%s3663_s9 + $0x264] ss:$16 sps:$4 sm:$0xff]   ;;  %v3849_v15 = vld [vmem:[%s3663_s9 + $0x26c] ss:$16 sps:$4 sm:$0xff]  }
  0x8f   : > { %1549 = vmatprep.subr.bf16.mxu0 %v2911_v28  ;;  %1678 = vmatprep.subr.bf16.mxu1 %v2913_v29  ;;  %v3852_v16 = vld [vmem:[%s3663_s9 + $0x260] ss:$16 sps:$4 sm:$0xff]   ;;  %v3855_v17 = vld [vmem:[%s3663_s9 + $0x268] ss:$16 sps:$4 sm:$0xff]   ;;  %v3860_v18 = vld [vmem:[%s3663_s9 + $0x284] ss:$16 sps:$4 sm:$0xff]  }
  0x90   : > { %v3865_v19 = vld [vmem:[%s3663_s9 + $0x28c] ss:$16 sps:$4 sm:$0xff]   ;;  %v3868_v20 = vld [vmem:[%s3663_s9 + $0x280] ss:$16 sps:$4 sm:$0xff]   ;;  %v3871_v21 = vld [vmem:[%s3663_s9 + $0x288] ss:$16 sps:$4 sm:$0xff]  }
  0x91   : > { %v3876_v22 = vld [vmem:[%s3663_s9 + $0x2a4] ss:$16 sps:$4 sm:$0xff]   ;;  %v3881_v23 = vld [vmem:[%s3663_s9 + $0x2ac] ss:$16 sps:$4 sm:$0xff]   ;;  %v3884_v24 = vld [vmem:[%s3663_s9 + $0x2a0] ss:$16 sps:$4 sm:$0xff]  }
  0x92   : > { %1550 = vmatpush1.bf16.msra.mxu0 %v2915_v30  ;;  %1679 = vmatpush1.bf16.msra.mxu1 %v2916_v31  ;;  %v3887_v25 = vld [vmem:[%s3663_s9 + $0x2a8] ss:$16 sps:$4 sm:$0xff]   ;;  %v3892_v26 = vld [vmem:[%s3663_s9 + $0x2c4] ss:$16 sps:$4 sm:$0xff]   ;;  %v3897_v27 = vld [vmem:[%s3663_s9 + $0x2cc] ss:$16 sps:$4 sm:$0xff]  }
  0x93   : > { %1551 = vmatprep.subr.bf16.mxu0 %v2917_v32  ;;  %1680 = vmatprep.subr.bf16.mxu1 %v2919_v33  ;;  %v3900_v28 = vld [vmem:[%s3663_s9 + $0x2c0] ss:$16 sps:$4 sm:$0xff]   ;;  %v3903_v29 = vld [vmem:[%s3663_s9 + $0x2c8] ss:$16 sps:$4 sm:$0xff]   ;;  %v3066_v30 = vld [vmem:[#allocation4 + $0xc] ss:$24 sps:$4 sm:$0xff]  }
  0x94   : > { %v3908_v31 = vld [vmem:[%s3663_s9 + $0x2e4] ss:$16 sps:$4 sm:$0xff]   ;;  %v3913_v32 = vld [vmem:[%s3663_s9 + $0x2ec] ss:$16 sps:$4 sm:$0xff]   ;;  %v3916_v33 = vld [vmem:[%s3663_s9 + $0x2e0] ss:$16 sps:$4 sm:$0xff]  }
  0x95   : > { %v3951_v48 = vld [vmem:[%s3663_s9 + $0x328] ss:$16 sps:$4 sm:$0xff]   ;;  %s2523_s21 = sshll.u32 %s3660_s24, 3  ;;  %s2738_s25 = sshll.u32 %s3417_s18, 7 }
  0x96   : > { %1552 = vmatpush1.bf16.msra.mxu0 %v2921_v34  ;;  %1681 = vmatpush1.bf16.msra.mxu1 %v2922_v35  ;;  %v3919_v34 = vld [vmem:[%s3663_s9 + $0x2e8] ss:$16 sps:$4 sm:$0xff]   ;;  %v3924_v35 = vld [vmem:[%s3663_s9 + $0x304] ss:$16 sps:$4 sm:$0xff]   ;;  %4752 = vst [vmem:[#allocation26_spill] sm:$0xff] %v3951_v48  ;;  %s296_s22 = scalar_lea.vmem [#allocation10], %s2523_s21  ;;  %s4549_s12 = scalar_lea.hbm %s4630_s3, %s2738_s25 }
  0x97   : > { %1553 = vmatprep.subr.bf16.mxu0 %v2923_v36  ;;  %1682 = vmatprep.subr.bf16.mxu1 %v2925_v37  ;;  %4744 = vst [vmem:[#allocation18_spill] sm:$0xff] %v3919_v34  ;;  %4745 = vst [vmem:[#allocation19_spill] sm:$0xff] %v3924_v35  ;;  %v3929_v36 = vld [vmem:[%s3663_s9 + $0x30c] ss:$16 sps:$4 sm:$0xff]   ;;  %v3932_v37 = vld [vmem:[%s3663_s9 + $0x300] ss:$16 sps:$4 sm:$0xff]   ;;  %s4556_s5 = scalar_lea.hbm %s4631_s4, %s2738_s25 }
  0x98   : > { %4746 = vst [vmem:[#allocation20_spill] sm:$0xff] %v3929_v36  ;;  %4747 = vst [vmem:[#allocation21_spill] sm:$0xff] %v3932_v37  ;;  %s2353_s7 = sshll.u32 %s296_s22, 4  ;;  %s4543_s11 = scalar_lea.vmem [#allocation11], %s2523_s21  ;;  %s4551_s7 = int_to_ptr.vmem [resolvable:$true] %s2353_s7 }
  0x99   : > { %s2367_s29 = sshll.u32 %s4543_s11, 4  ;;  %s2334_s8 = scalar_lea.sflag [#allocation6], %s3660_s24  ;;  %s4558_s29 = int_to_ptr.vmem [resolvable:$true] %s2367_s29 }
  0x9a   : > { %1554 = vmatpush1.bf16.msra.mxu0 %v2927_v38  ;;  %1683 = vmatpush1.bf16.msra.mxu1 %v2928_v39  ;;  %v3935_v38 = vld [vmem:[%s3663_s9 + $0x308] ss:$16 sps:$4 sm:$0xff]   ;;  %v3940_v39 = vld [vmem:[%s3663_s9 + $0x324] ss:$16 sps:$4 sm:$0xff]   ;;  %s3303_s28 = scalar_lea.vmem %s4551_s7, 128  ;;  %p4936_p7 = scmp.ne.s32.totalorder %s4733_s26, 0 }
  0x9b   : > { %1555 = vmatprep.subr.bf16.mxu0 %v2929_v40  ;;  %1684 = vmatprep.subr.bf16.mxu1 %v2931_v41  ;;  %4748 = vst [vmem:[#allocation22_spill] sm:$0xff] %v3935_v38  ;;  %4749 = vst [vmem:[#allocation23_spill] sm:$0xff] %v3940_v39  ;;  %v3945_v40 = vld [vmem:[%s3663_s9 + $0x32c] ss:$16 sps:$4 sm:$0xff]   ;;  %v3948_v41 = vld [vmem:[%s3663_s9 + $0x320] ss:$16 sps:$4 sm:$0xff]   ;;  %p3304_p2 = scmp.ne.s32.totalorder %s4551_s7, %s3303_s28 }
  0x9c   : > { %4750 = vst [vmem:[#allocation24_spill] sm:$0xff] %v3945_v40  ;;  %4751 = vst [vmem:[#allocation25_spill] sm:$0xff] %v3948_v41  ;;  %s3436_s6 = smov [#allocation10]  }
  0x9d   : > { %p3305_p6 = pnand %p3304_p2, %p4936_p7 }
  0x9e   : > { %1556 = vmatpush1.bf16.msra.mxu0 %v3712_v42  ;;  %1685 = vmatpush1.bf16.msra.mxu1 %v3715_v43 }
  0x9f   : > { %1557 = vmatprep.subr.bf16.mxu0 %v3718_v44  ;;  %1686 = vmatprep.subr.bf16.mxu1 %v3721_v45  ;;  %p3306_p1 = pneg %p3305_p6 }
  0xa2   : > { %1558 = vmatpush1.bf16.msra.mxu0 %v3724_v46  ;;  %1687 = vmatpush1.bf16.msra.mxu1 %v3727_v47 }
  0xa3   : > { %1559 = vmatprep.subr.bf16.mxu0 %v3732_v49  ;;  %1688 = vmatprep.subr.bf16.mxu1 %v3737_v50 }
  0xa6   : > { %1560 = vmatpush1.bf16.msra.mxu0 %v3740_v51  ;;  %1689 = vmatpush1.bf16.msra.mxu1 %v3743_v52 }
  0xa7   : > { %1561 = vmatprep.subr.bf16.mxu0 %v3748_v53  ;;  %1690 = vmatprep.subr.bf16.mxu1 %v3753_v54 }
  0xaa   : > { %1562 = vmatpush1.bf16.msra.mxu0 %v3756_v55  ;;  %1691 = vmatpush1.bf16.msra.mxu1 %v3759_v56 }
  0xab   : > { %1563 = vmatprep.subr.bf16.mxu0 %v3764_v57  ;;  %1692 = vmatprep.subr.bf16.mxu1 %v3769_v58 }
  0xae   : > { %1564 = vmatpush1.bf16.msra.mxu0 %v3772_v59  ;;  %1693 = vmatpush1.bf16.msra.mxu1 %v3775_v60 }
  0xaf   : > { %1565 = vmatprep.subr.bf16.mxu0 %v3780_v61  ;;  %1694 = vmatprep.subr.bf16.mxu1 %v3785_v62 }
  0xb2   : > { %1566 = vmatpush1.bf16.msra.mxu0 %v3788_v63  ;;  %1695 = vmatpush1.bf16.msra.mxu1 %v3791_v0 }
  0xb3   : > { %1578 = vmatprep.subr.bf16.mxu0 %v3796_v1  ;;  %1707 = vmatprep.subr.bf16.mxu1 %v3801_v2 }
  0xb5   : > { %1568 = vmatmul.mubr.bf16.vlgmr.msra.gmra.mrb[0].mxu0 %v2965_v3  ;;  %1697 = vmatmul.mubr.bf16.vlgmr.msra.gmra.mrb[0].mxu1 %v2965_v3  ;;  %v3956_v3 = vld [vmem:[%s3663_s9 + $0x344] ss:$16 sps:$4 sm:$0xff]  }
  0xb6   : > { %1579 = vmatpush1.bf16.msra.mxu0 %v3804_v4  ;;  %1708 = vmatpush1.bf16.msra.mxu1 %v3807_v5  ;;  %4753 = vst [vmem:[#allocation27_spill] sm:$0xff] %v3956_v3 }
  0xb7   : > { %1580 = vmatprep.subr.bf16.mxu0 %v3812_v6  ;;  %1709 = vmatprep.subr.bf16.mxu1 %v3817_v7 }
  0xb8   : > { %1610 = vmatprep.mubr.bf16.mxu0 %v3066_v30  ;;  %1739 = vmatprep.mubr.bf16.mxu1 %v3066_v30  ;;  %v3961_v30 = vld [vmem:[%s3663_s9 + $0x34c] ss:$16 sps:$4 sm:$0xff]  }
  0xb9   : > { %4754 = vst [vmem:[#allocation28_spill] sm:$0xff] %v3961_v30 }
  0xba   : > { %1581 = vmatpush1.bf16.msra.mxu0 %v3820_v8  ;;  %1710 = vmatpush1.bf16.msra.mxu1 %v3823_v9 }
  0xbb   : > { %1582 = vmatprep.subr.bf16.mxu0 %v3828_v10  ;;  %1711 = vmatprep.subr.bf16.mxu1 %v3833_v11 }
  0xbe   : > { %1583 = vmatpush1.bf16.msra.mxu0 %v3836_v12  ;;  %1712 = vmatpush1.bf16.msra.mxu1 %v3839_v13 }
  0xbf   : > { %1584 = vmatprep.subr.bf16.mxu0 %v3844_v14  ;;  %1713 = vmatprep.subr.bf16.mxu1 %v3849_v15 }
  0xc2   : > { %1585 = vmatpush1.bf16.msra.mxu0 %v3852_v16  ;;  %1714 = vmatpush1.bf16.msra.mxu1 %v3855_v17 }
  0xc3   : > { %1586 = vmatprep.subr.bf16.mxu0 %v3860_v18  ;;  %1715 = vmatprep.subr.bf16.mxu1 %v3865_v19 }
  0xc6   : > { %1587 = vmatpush1.bf16.msra.mxu0 %v3868_v20  ;;  %1716 = vmatpush1.bf16.msra.mxu1 %v3871_v21 }
  0xc7   : > { %1588 = vmatprep.subr.bf16.mxu0 %v3876_v22  ;;  %1717 = vmatprep.subr.bf16.mxu1 %v3881_v23 }
  0xca   : > { %1589 = vmatpush1.bf16.msra.mxu0 %v3884_v24  ;;  %1718 = vmatpush1.bf16.msra.mxu1 %v3887_v25 }
  0xcb   : > { %1590 = vmatprep.subr.bf16.mxu0 %v3892_v26  ;;  %1719 = vmatprep.subr.bf16.mxu1 %v3897_v27 }
  0xce   : > { %1591 = vmatpush1.bf16.msra.mxu0 %v3900_v28  ;;  %1720 = vmatpush1.bf16.msra.mxu1 %v3903_v29 }
  0xcf   : > { %1592 = vmatprep.subr.bf16.mxu0 %v3908_v31  ;;  %1721 = vmatprep.subr.bf16.mxu1 %v3913_v32 }
  0xd2   : > { %1593 = vmatpush1.bf16.msra.mxu0 %v3916_v33  ;;  %1722 = vmatpush1.bf16.msra.mxu1 %v3919_v34  ;;  %v4063_v34 = vld [vmem:[%s3663_s9 + $0x408] ss:$16 sps:$4 sm:$0xff]  }
  0xd3   : > { %1594 = vmatprep.subr.bf16.mxu0 %v3924_v35  ;;  %1723 = vmatprep.subr.bf16.mxu1 %v3929_v36  ;;  %v3964_v36 = vld [vmem:[%s3663_s9 + $0x340] ss:$16 sps:$4 sm:$0xff]   ;;  %v3967_v35 = vld [vmem:[%s3663_s9 + $0x348] ss:$16 sps:$4 sm:$0xff]   ;;  %4779 = vst [vmem:[#allocation53_spill] sm:$0xff] %v4063_v34 }
  0xd4   : > { %4755 = vst [vmem:[#allocation29_spill] sm:$0xff] %v3964_v36  ;;  %4756 = vst [vmem:[#allocation30_spill] sm:$0xff] %v3967_v35 }
  0xd6   : > { %1595 = vmatpush1.bf16.msra.mxu0 %v3932_v37  ;;  %1724 = vmatpush1.bf16.msra.mxu1 %v3935_v38  ;;  %v3972_v38 = vld [vmem:[%s3663_s9 + $0x364] ss:$16 sps:$4 sm:$0xff]   ;;  %v3983_v37 = vld [vmem:[%s3663_s9 + $0x368] ss:$16 sps:$4 sm:$0xff]  }
  0xd7   : > { %1596 = vmatprep.subr.bf16.mxu0 %v3940_v39  ;;  %1725 = vmatprep.subr.bf16.mxu1 %v3945_v40  ;;  %4757 = vst [vmem:[#allocation31_spill] sm:$0xff] %v3972_v38  ;;  %v3977_v40 = vld [vmem:[%s3663_s9 + $0x36c] ss:$16 sps:$4 sm:$0xff]   ;;  %v3980_v39 = vld [vmem:[%s3663_s9 + $0x360] ss:$16 sps:$4 sm:$0xff]   ;;  %4760 = vst [vmem:[#allocation34_spill] sm:$0xff] %v3983_v37 }
  0xd8   : > { %4758 = vst [vmem:[#allocation32_spill] sm:$0xff] %v3977_v40  ;;  %4759 = vst [vmem:[#allocation33_spill] sm:$0xff] %v3980_v39 }
  0xda   : > { %1597 = vmatpush1.bf16.msra.mxu0 %v3948_v41  ;;  %1726 = vmatpush1.bf16.msra.mxu1 %v3951_v48  ;;  %v3988_v48 = vld [vmem:[%s3663_s9 + $0x384] ss:$16 sps:$4 sm:$0xff]   ;;  %v3999_v41 = vld [vmem:[%s3663_s9 + $0x388] ss:$16 sps:$4 sm:$0xff]  }
  0xdb   : > { %1598 = vmatprep.subr.bf16.mxu0 %v3956_v3  ;;  %1727 = vmatprep.subr.bf16.mxu1 %v3961_v30  ;;  %4761 = vst [vmem:[#allocation35_spill] sm:$0xff] %v3988_v48  ;;  %v3993_v30 = vld [vmem:[%s3663_s9 + $0x38c] ss:$16 sps:$4 sm:$0xff]   ;;  %v3996_v3 = vld [vmem:[%s3663_s9 + $0x380] ss:$16 sps:$4 sm:$0xff]   ;;  %4764 = vst [vmem:[#allocation38_spill] sm:$0xff] %v3999_v41 }
  0xdc   : > { %4762 = vst [vmem:[#allocation36_spill] sm:$0xff] %v3993_v30  ;;  %4763 = vst [vmem:[#allocation37_spill] sm:$0xff] %v3996_v3 }
  0xde   : > { %1599 = vmatpush1.bf16.msra.mxu0 %v3964_v36  ;;  %1728 = vmatpush1.bf16.msra.mxu1 %v3967_v35  ;;  %v4004_v35 = vld [vmem:[%s3663_s9 + $0x3a4] ss:$16 sps:$4 sm:$0xff]   ;;  %v4015_v36 = vld [vmem:[%s3663_s9 + $0x3a8] ss:$16 sps:$4 sm:$0xff]  }
  0xdf   : > { %1600 = vmatprep.subr.bf16.mxu0 %v3972_v38  ;;  %1729 = vmatprep.subr.bf16.mxu1 %v3977_v40  ;;  %4765 = vst [vmem:[#allocation39_spill] sm:$0xff] %v4004_v35  ;;  %v4009_v40 = vld [vmem:[%s3663_s9 + $0x3ac] ss:$16 sps:$4 sm:$0xff]   ;;  %v4012_v38 = vld [vmem:[%s3663_s9 + $0x3a0] ss:$16 sps:$4 sm:$0xff]   ;;  %4768 = vst [vmem:[#allocation42_spill] sm:$0xff] %v4015_v36 }
  0xe0   : > { %4766 = vst [vmem:[#allocation40_spill] sm:$0xff] %v4009_v40  ;;  %4767 = vst [vmem:[#allocation41_spill] sm:$0xff] %v4012_v38 }
  0xe2   : > { %1601 = vmatpush1.bf16.msra.mxu0 %v3980_v39  ;;  %1730 = vmatpush1.bf16.msra.mxu1 %v3983_v37  ;;  %v4020_v37 = vld [vmem:[%s3663_s9 + $0x3c4] ss:$16 sps:$4 sm:$0xff]   ;;  %v4031_v39 = vld [vmem:[%s3663_s9 + $0x3c8] ss:$16 sps:$4 sm:$0xff]  }
  0xe3   : > { %1602 = vmatprep.subr.bf16.mxu0 %v3988_v48  ;;  %1731 = vmatprep.subr.bf16.mxu1 %v3993_v30  ;;  %4769 = vst [vmem:[#allocation43_spill] sm:$0xff] %v4020_v37  ;;  %v4025_v30 = vld [vmem:[%s3663_s9 + $0x3cc] ss:$16 sps:$4 sm:$0xff]   ;;  %v4028_v48 = vld [vmem:[%s3663_s9 + $0x3c0] ss:$16 sps:$4 sm:$0xff]   ;;  %4772 = vst [vmem:[#allocation46_spill] sm:$0xff] %v4031_v39 }
  0xe4   : > { %4770 = vst [vmem:[#allocation44_spill] sm:$0xff] %v4025_v30  ;;  %4771 = vst [vmem:[#allocation45_spill] sm:$0xff] %v4028_v48 }
  0xe6   : > { %1603 = vmatpush1.bf16.msra.mxu0 %v3996_v3  ;;  %1732 = vmatpush1.bf16.msra.mxu1 %v3999_v41  ;;  %v4036_v41 = vld [vmem:[%s3663_s9 + $0x3e4] ss:$16 sps:$4 sm:$0xff]   ;;  %v4047_v3 = vld [vmem:[%s3663_s9 + $0x3e8] ss:$16 sps:$4 sm:$0xff]  }
  0xe7   : > { %1604 = vmatprep.subr.bf16.mxu0 %v4004_v35  ;;  %1733 = vmatprep.subr.bf16.mxu1 %v4009_v40  ;;  %4773 = vst [vmem:[#allocation47_spill] sm:$0xff] %v4036_v41  ;;  %v4041_v40 = vld [vmem:[%s3663_s9 + $0x3ec] ss:$16 sps:$4 sm:$0xff]   ;;  %v4044_v35 = vld [vmem:[%s3663_s9 + $0x3e0] ss:$16 sps:$4 sm:$0xff]  }
  0xe8   : > { %4774 = vst [vmem:[#allocation48_spill] sm:$0xff] %v4041_v40  ;;  %4775 = vst [vmem:[#allocation49_spill] sm:$0xff] %v4044_v35 }
  0xea   : > { %1605 = vmatpush1.bf16.msra.mxu0 %v4012_v38  ;;  %1734 = vmatpush1.bf16.msra.mxu1 %v4015_v36  ;;  %v4052_v36 = vld [vmem:[%s3663_s9 + $0x404] ss:$16 sps:$4 sm:$0xff]   ;;  %v4060_v38 = vld [vmem:[%s3663_s9 + $0x400] ss:$16 sps:$4 sm:$0xff]  }
  0xeb   : > { %1606 = vmatprep.subr.bf16.mxu0 %v4020_v37  ;;  %1735 = vmatprep.subr.bf16.mxu1 %v4025_v30  ;;  %4776 = vst [vmem:[#allocation50_spill] sm:$0xff] %v4052_v36  ;;  %v4057_v30 = vld [vmem:[%s3663_s9 + $0x40c] ss:$16 sps:$4 sm:$0xff]   ;;  %v3064_v37 = vld [vmem:[#allocation4 + $0x8] ss:$24 sps:$4 sm:$0xff]   ;;  %4778 = vst [vmem:[#allocation52_spill] sm:$0xff] %v4060_v38 }
  0xec   : > { %4777 = vst [vmem:[#allocation51_spill] sm:$0xff] %v4057_v30 }
  0xee   : > { %1607 = vmatpush1.bf16.msra.mxu0 %v4028_v48  ;;  %1736 = vmatpush1.bf16.msra.mxu1 %v4031_v39  ;;  %v4068_v39 = vld [vmem:[%s3663_s9 + $0x424] ss:$16 sps:$4 sm:$0xff]   ;;  %v4079_v48 = vld [vmem:[%s3663_s9 + $0x428] ss:$16 sps:$4 sm:$0xff]  }
  0xef   : > { %1608 = vmatprep.subr.bf16.mxu0 %v4036_v41  ;;  %1737 = vmatprep.subr.bf16.mxu1 %v4041_v40  ;;  %4780 = vst [vmem:[#allocation54_spill] sm:$0xff] %v4068_v39  ;;  %v4073_v40 = vld [vmem:[%s3663_s9 + $0x42c] ss:$16 sps:$4 sm:$0xff]   ;;  %v4076_v41 = vld [vmem:[%s3663_s9 + $0x420] ss:$16 sps:$4 sm:$0xff]   ;;  %4783 = vst [vmem:[#allocation57_spill] sm:$0xff] %v4079_v48 }
  0xf0   : > { %4781 = vst [vmem:[#allocation55_spill] sm:$0xff] %v4073_v40  ;;  %4782 = vst [vmem:[#allocation56_spill] sm:$0xff] %v4076_v41 }
  0xf2   : > { %1609 = vmatpush1.bf16.msra.mxu0 %v4044_v35  ;;  %1738 = vmatpush1.bf16.msra.mxu1 %v4047_v3  ;;  %v3165_v35 = vld [vmem:[#allocation4 + $0x14] ss:$24 sps:$4 sm:$0xff]  }
  0xf3   : > { %1621 = vmatprep.subr.bf16.mxu0 %v4052_v36  ;;  %1750 = vmatprep.subr.bf16.mxu1 %v4057_v30  ;;  %v4084_v36 = vld [vmem:[%s3663_s9 + $0x444] ss:$16 sps:$4 sm:$0xff]   ;;  %v4089_v30 = vld [vmem:[%s3663_s9 + $0x44c] ss:$16 sps:$4 sm:$0xff]  }
  0xf4   : > { %4784 = vst [vmem:[#allocation58_spill] sm:$0xff] %v4084_v36  ;;  %4785 = vst [vmem:[#allocation59_spill] sm:$0xff] %v4089_v30 }
  0xf5   : > { %1611 = vmatmul.mubr.bf16.vlgmr.msra.gmra.mrb[0].mxu0 %v3064_v37  ;;  %1740 = vmatmul.mubr.bf16.vlgmr.msra.gmra.mrb[0].mxu1 %v3064_v37  ;;  %v4094_v37 = vld [vmem:[%s3663_s9 + $0x440] ss:$16 sps:$4 sm:$0xff]  }
  0xf6   : > { %1622 = vmatpush1.bf16.msra.mxu0 %v4060_v38  ;;  %1751 = vmatpush1.bf16.msra.mxu1 %v4063_v34  ;;  %4786 = vst [vmem:[#allocation60_spill] sm:$0xff] %v4094_v37  ;;  %v4097_v34 = vld [vmem:[%s3663_s9 + $0x448] ss:$16 sps:$4 sm:$0xff]   ;;  %v3215_v38 = vld [vmem:[%s3663_s9 + $0x144] ss:$16 sps:$4 sm:$0xff]  }
  0xf7   : > { %1623 = vmatprep.subr.bf16.mxu0 %v4068_v39  ;;  %1752 = vmatprep.subr.bf16.mxu1 %v4073_v40  ;;  %4787 = vst [vmem:[#allocation61_spill] sm:$0xff] %v4097_v34  ;;  %v4102_v40 = vld [vmem:[%s3663_s9 + $0x464] ss:$16 sps:$4 sm:$0xff]   ;;  %v4105_v39 = vld [vmem:[%s3663_s9 + $0x46c] ss:$16 sps:$4 sm:$0xff]  }
  0xf8   : > { %1653 = vmatprep.mubr.bf16.mxu0 %v3165_v35  ;;  %1782 = vmatprep.mubr.bf16.mxu1 %v3165_v35  ;;  %4788 = vst [vmem:[#allocation62_spill] sm:$0xff] %v4102_v40  ;;  %4789 = vst [vmem:[#allocation63_spill] sm:$0xff] %v4105_v39  ;;  %v4110_v35 = vld [vmem:[%s3663_s9 + $0x460] ss:$16 sps:$4 sm:$0xff]  }
  0xf9   : > { %4790 = vst [vmem:[#allocation64_spill] sm:$0xff] %v4110_v35 }
  0xfa   : > { %1624 = vmatpush1.bf16.msra.mxu0 %v4076_v41  ;;  %1753 = vmatpush1.bf16.msra.mxu1 %v4079_v48  ;;  %v4113_v48 = vld [vmem:[%s3663_s9 + $0x468] ss:$16 sps:$4 sm:$0xff]   ;;  %v3179_v41 = vld [vmem:[%s3663_s9 + $0x24] ss:$16 sps:$4 sm:$0xff]  }
  0xfb   : > { %1625 = vmatprep.subr.bf16.mxu0 %v4084_v36  ;;  %1754 = vmatprep.subr.bf16.mxu1 %v4089_v30  ;;  %4791 = vst [vmem:[#allocation65_spill] sm:$0xff] %v4113_v48  ;;  %v4118_v30 = vld [vmem:[%s3663_s9 + $0x484] ss:$16 sps:$4 sm:$0xff]   ;;  %v4121_v36 = vld [vmem:[%s3663_s9 + $0x48c] ss:$16 sps:$4 sm:$0xff]  }
  0xfc   : > { %4792 = vst [vmem:[#allocation66_spill] sm:$0xff] %v4118_v30  ;;  %4793 = vst [vmem:[#allocation67_spill] sm:$0xff] %v4121_v36 }
  0xfe   : > { %1626 = vmatpush1.bf16.msra.mxu0 %v4094_v37  ;;  %1755 = vmatpush1.bf16.msra.mxu1 %v4097_v34  ;;  %v4126_v34 = vld [vmem:[%s3663_s9 + $0x480] ss:$16 sps:$4 sm:$0xff]   ;;  %v4129_v37 = vld [vmem:[%s3663_s9 + $0x488] ss:$16 sps:$4 sm:$0xff]  }
  0xff   : > { %1627 = vmatprep.subr.bf16.mxu0 %v4102_v40  ;;  %1756 = vmatprep.subr.bf16.mxu1 %v4105_v39  ;;  %4794 = vst [vmem:[#allocation68_spill] sm:$0xff] %v4126_v34  ;;  %4795 = vst [vmem:[#allocation69_spill] sm:$0xff] %v4129_v37  ;;  %v4134_v39 = vld [vmem:[%s3663_s9 + $0x4a4] ss:$16 sps:$4 sm:$0xff]   ;;  %v4137_v40 = vld [vmem:[%s3663_s9 + $0x4ac] ss:$16 sps:$4 sm:$0xff]  }
 0x100   : > { %4796 = vst [vmem:[#allocation70_spill] sm:$0xff] %v4134_v39  ;;  %4797 = vst [vmem:[#allocation71_spill] sm:$0xff] %v4137_v40 }
 0x102   : > { %1628 = vmatpush1.bf16.msra.mxu0 %v4110_v35  ;;  %1757 = vmatpush1.bf16.msra.mxu1 %v4113_v48  ;;  %v4142_v48 = vld [vmem:[%s3663_s9 + $0x4a0] ss:$16 sps:$4 sm:$0xff]   ;;  %v4145_v35 = vld [vmem:[%s3663_s9 + $0x4a8] ss:$16 sps:$4 sm:$0xff]  }
 0x103   : > { %1629 = vmatprep.subr.bf16.mxu0 %v4118_v30  ;;  %1758 = vmatprep.subr.bf16.mxu1 %v4121_v36  ;;  %4798 = vst [vmem:[#allocation72_spill] sm:$0xff] %v4142_v48  ;;  %4799 = vst [vmem:[#allocation73_spill] sm:$0xff] %v4145_v35  ;;  %v4150_v36 = vld [vmem:[%s3663_s9 + $0x4c4] ss:$16 sps:$4 sm:$0xff]   ;;  %v4153_v30 = vld [vmem:[%s3663_s9 + $0x4cc] ss:$16 sps:$4 sm:$0xff]  }
 0x104   : > { %4800 = vst [vmem:[#allocation74_spill] sm:$0xff] %v4150_v36  ;;  %4801 = vst [vmem:[#allocation75_spill] sm:$0xff] %v4153_v30 }
 0x106   : > { %1630 = vmatpush1.bf16.msra.mxu0 %v4126_v34  ;;  %1759 = vmatpush1.bf16.msra.mxu1 %v4129_v37  ;;  %v4158_v37 = vld [vmem:[%s3663_s9 + $0x4c0] ss:$16 sps:$4 sm:$0xff]   ;;  %v4161_v34 = vld [vmem:[%s3663_s9 + $0x4c8] ss:$16 sps:$4 sm:$0xff]  }
 0x107   : > { %1631 = vmatprep.subr.bf16.mxu0 %v4134_v39  ;;  %1760 = vmatprep.subr.bf16.mxu1 %v4137_v40  ;;  %4802 = vst [vmem:[#allocation76_spill] sm:$0xff] %v4158_v37  ;;  %4803 = vst [vmem:[#allocation77_spill] sm:$0xff] %v4161_v34  ;;  %v4166_v40 = vld [vmem:[%s3663_s9 + $0x4e4] ss:$16 sps:$4 sm:$0xff]   ;;  %v4169_v39 = vld [vmem:[%s3663_s9 + $0x4ec] ss:$16 sps:$4 sm:$0xff]  }
 0x108   : > { %4804 = vst [vmem:[#allocation78_spill] sm:$0xff] %v4166_v40  ;;  %4805 = vst [vmem:[#allocation79_spill] sm:$0xff] %v4169_v39 }
 0x10a   : > { %1632 = vmatpush1.bf16.msra.mxu0 %v4142_v48  ;;  %1761 = vmatpush1.bf16.msra.mxu1 %v4145_v35  ;;  %v4174_v35 = vld [vmem:[%s3663_s9 + $0x4e0] ss:$16 sps:$4 sm:$0xff]   ;;  %v4177_v48 = vld [vmem:[%s3663_s9 + $0x4e8] ss:$16 sps:$4 sm:$0xff]  }
 0x10b   : > { %1633 = vmatprep.subr.bf16.mxu0 %v4150_v36  ;;  %1762 = vmatprep.subr.bf16.mxu1 %v4153_v30  ;;  %4806 = vst [vmem:[#allocation80_spill] sm:$0xff] %v4174_v35  ;;  %4807 = vst [vmem:[#allocation81_spill] sm:$0xff] %v4177_v48  ;;  %v4182_v30 = vld [vmem:[%s3663_s9 + $0x504] ss:$16 sps:$4 sm:$0xff]   ;;  %v4185_v36 = vld [vmem:[%s3663_s9 + $0x50c] ss:$16 sps:$4 sm:$0xff]  }
 0x10c   : > { %4808 = vst [vmem:[#allocation82_spill] sm:$0xff] %v4182_v30  ;;  %4809 = vst [vmem:[#allocation83_spill] sm:$0xff] %v4185_v36 }
 0x10e   : > { %1634 = vmatpush1.bf16.msra.mxu0 %v4158_v37  ;;  %1763 = vmatpush1.bf16.msra.mxu1 %v4161_v34  ;;  %v4190_v34 = vld [vmem:[%s3663_s9 + $0x500] ss:$16 sps:$4 sm:$0xff]   ;;  %v4193_v37 = vld [vmem:[%s3663_s9 + $0x508] ss:$16 sps:$4 sm:$0xff]  }
 0x10f   : > { %1635 = vmatprep.subr.bf16.mxu0 %v4166_v40  ;;  %1764 = vmatprep.subr.bf16.mxu1 %v4169_v39  ;;  %4810 = vst [vmem:[#allocation84_spill] sm:$0xff] %v4190_v34  ;;  %4811 = vst [vmem:[#allocation85_spill] sm:$0xff] %v4193_v37  ;;  %v4198_v39 = vld [vmem:[%s3663_s9 + $0x524] ss:$16 sps:$4 sm:$0xff]   ;;  %v4201_v40 = vld [vmem:[%s3663_s9 + $0x52c] ss:$16 sps:$4 sm:$0xff]  }
 0x110   : > { %4812 = vst [vmem:[#allocation86_spill] sm:$0xff] %v4198_v39  ;;  %4813 = vst [vmem:[#allocation87_spill] sm:$0xff] %v4201_v40 }
 0x112   : > { %1636 = vmatpush1.bf16.msra.mxu0 %v4174_v35  ;;  %1765 = vmatpush1.bf16.msra.mxu1 %v4177_v48  ;;  %v4206_v48 = vld [vmem:[%s3663_s9 + $0x520] ss:$16 sps:$4 sm:$0xff]   ;;  %v4209_v35 = vld [vmem:[%s3663_s9 + $0x528] ss:$16 sps:$4 sm:$0xff]  }
 0x113   : > { %1637 = vmatprep.subr.bf16.mxu0 %v4182_v30  ;;  %1766 = vmatprep.subr.bf16.mxu1 %v4185_v36  ;;  %4814 = vst [vmem:[#allocation88_spill] sm:$0xff] %v4206_v48  ;;  %4815 = vst [vmem:[#allocation89_spill] sm:$0xff] %v4209_v35  ;;  %v4214_v36 = vld [vmem:[%s3663_s9 + $0x544] ss:$16 sps:$4 sm:$0xff]   ;;  %v4217_v30 = vld [vmem:[%s3663_s9 + $0x54c] ss:$16 sps:$4 sm:$0xff]  }
 0x114   : > { %4816 = vst [vmem:[#allocation90_spill] sm:$0xff] %v4214_v36  ;;  %4817 = vst [vmem:[#allocation91_spill] sm:$0xff] %v4217_v30 }
 0x116   : > { %1638 = vmatpush1.bf16.msra.mxu0 %v4190_v34  ;;  %1767 = vmatpush1.bf16.msra.mxu1 %v4193_v37  ;;  %v4222_v37 = vld [vmem:[%s3663_s9 + $0x540] ss:$16 sps:$4 sm:$0xff]   ;;  %v4225_v34 = vld [vmem:[%s3663_s9 + $0x548] ss:$16 sps:$4 sm:$0xff]  }
 0x117   : > { %1639 = vmatprep.subr.bf16.mxu0 %v4198_v39  ;;  %1768 = vmatprep.subr.bf16.mxu1 %v4201_v40  ;;  %4818 = vst [vmem:[#allocation92_spill] sm:$0xff] %v4222_v37  ;;  %4819 = vst [vmem:[#allocation93_spill] sm:$0xff] %v4225_v34  ;;  %v4230_v40 = vld [vmem:[%s3663_s9 + $0x564] ss:$16 sps:$4 sm:$0xff]   ;;  %v4233_v39 = vld [vmem:[%s3663_s9 + $0x56c] ss:$16 sps:$4 sm:$0xff]  }
 0x118   : > { %4820 = vst [vmem:[#allocation94_spill] sm:$0xff] %v4230_v40  ;;  %4821 = vst [vmem:[#allocation95_spill] sm:$0xff] %v4233_v39 }
 0x11a   : > { %1640 = vmatpush1.bf16.msra.mxu0 %v4206_v48  ;;  %1769 = vmatpush1.bf16.msra.mxu1 %v4209_v35  ;;  %v4238_v35 = vld [vmem:[%s3663_s9 + $0x560] ss:$16 sps:$4 sm:$0xff]   ;;  %v4241_v48 = vld [vmem:[%s3663_s9 + $0x568] ss:$16 sps:$4 sm:$0xff]  }
 0x11b   : > { %1641 = vmatprep.subr.bf16.mxu0 %v4214_v36  ;;  %1770 = vmatprep.subr.bf16.mxu1 %v4217_v30  ;;  %4822 = vst [vmem:[#allocation96_spill] sm:$0xff] %v4238_v35  ;;  %4823 = vst [vmem:[#allocation97_spill] sm:$0xff] %v4241_v48  ;;  %v4246_v30 = vld [vmem:[%s3663_s9 + $0x584] ss:$16 sps:$4 sm:$0xff]   ;;  %v4249_v36 = vld [vmem:[%s3663_s9 + $0x58c] ss:$16 sps:$4 sm:$0xff]  }
 0x11c   : > { %4824 = vst [vmem:[#allocation98_spill] sm:$0xff] %v4246_v30  ;;  %4825 = vst [vmem:[#allocation99_spill] sm:$0xff] %v4249_v36 }
 0x11e   : > { %1642 = vmatpush1.bf16.msra.mxu0 %v4222_v37  ;;  %1771 = vmatpush1.bf16.msra.mxu1 %v4225_v34  ;;  %v4254_v34 = vld [vmem:[%s3663_s9 + $0x580] ss:$16 sps:$4 sm:$0xff]   ;;  %v4257_v37 = vld [vmem:[%s3663_s9 + $0x588] ss:$16 sps:$4 sm:$0xff]  }
 0x11f   : > { %1643 = vmatprep.subr.bf16.mxu0 %v4230_v40  ;;  %1772 = vmatprep.subr.bf16.mxu1 %v4233_v39  ;;  %4826 = vst [vmem:[#allocation100_spill] sm:$0xff] %v4254_v34  ;;  %4827 = vst [vmem:[#allocation101_spill] sm:$0xff] %v4257_v37  ;;  %v4262_v39 = vld [vmem:[%s3663_s9 + $0x5a4] ss:$16 sps:$4 sm:$0xff]   ;;  %v4265_v40 = vld [vmem:[%s3663_s9 + $0x5ac] ss:$16 sps:$4 sm:$0xff]  }
 0x120   : > { %4828 = vst [vmem:[#allocation102_spill] sm:$0xff] %v4262_v39  ;;  %4829 = vst [vmem:[#allocation103_spill] sm:$0xff] %v4265_v40 }
 0x122   : > { %1644 = vmatpush1.bf16.msra.mxu0 %v4238_v35  ;;  %1773 = vmatpush1.bf16.msra.mxu1 %v4241_v48  ;;  %v4270_v48 = vld [vmem:[%s3663_s9 + $0x5a0] ss:$16 sps:$4 sm:$0xff]   ;;  %v4273_v35 = vld [vmem:[%s3663_s9 + $0x5a8] ss:$16 sps:$4 sm:$0xff]  }
 0x123   : > { %1645 = vmatprep.subr.bf16.mxu0 %v4246_v30  ;;  %1774 = vmatprep.subr.bf16.mxu1 %v4249_v36  ;;  %4830 = vst [vmem:[#allocation104_spill] sm:$0xff] %v4270_v48  ;;  %4831 = vst [vmem:[#allocation105_spill] sm:$0xff] %v4273_v35  ;;  %v4278_v36 = vld [vmem:[%s3663_s9 + $0x5c4] ss:$16 sps:$4 sm:$0xff]   ;;  %v4281_v30 = vld [vmem:[%s3663_s9 + $0x5cc] ss:$16 sps:$4 sm:$0xff]  }
 0x124   : > { %4832 = vst [vmem:[#allocation106_spill] sm:$0xff] %v4278_v36  ;;  %4833 = vst [vmem:[#allocation107_spill] sm:$0xff] %v4281_v30 }
 0x126   : > { %1646 = vmatpush1.bf16.msra.mxu0 %v4254_v34  ;;  %1775 = vmatpush1.bf16.msra.mxu1 %v4257_v37  ;;  %v4286_v37 = vld [vmem:[%s3663_s9 + $0x5c0] ss:$16 sps:$4 sm:$0xff]   ;;  %v4289_v34 = vld [vmem:[%s3663_s9 + $0x5c8] ss:$16 sps:$4 sm:$0xff]  }
 0x127   : > { %1647 = vmatprep.subr.bf16.mxu0 %v4262_v39  ;;  %1776 = vmatprep.subr.bf16.mxu1 %v4265_v40  ;;  %4834 = vst [vmem:[#allocation108_spill] sm:$0xff] %v4286_v37  ;;  %4835 = vst [vmem:[#allocation109_spill] sm:$0xff] %v4289_v34  ;;  %v4294_v39 = vld [vmem:[%s3663_s9 + $0x5e4] ss:$16 sps:$4 sm:$0xff]   ;;  %v4297_v40 = vld [vmem:[%s3663_s9 + $0x5ec] ss:$16 sps:$4 sm:$0xff]  }
 0x128   : > { %4836 = vst [vmem:[#allocation110_spill] sm:$0xff] %v4294_v39  ;;  %4837 = vst [vmem:[#allocation111_spill] sm:$0xff] %v4297_v40 }
 0x12a   : > { %1648 = vmatpush1.bf16.msra.mxu0 %v4270_v48  ;;  %1777 = vmatpush1.bf16.msra.mxu1 %v4273_v35  ;;  %v4302_v35 = vld [vmem:[%s3663_s9 + $0x5e0] ss:$16 sps:$4 sm:$0xff]   ;;  %v4305_v48 = vld [vmem:[%s3663_s9 + $0x5e8] ss:$16 sps:$4 sm:$0xff]  }
 0x12b   : > { %1649 = vmatprep.subr.bf16.mxu0 %v4278_v36  ;;  %1778 = vmatprep.subr.bf16.mxu1 %v4281_v30  ;;  %4838 = vst [vmem:[#allocation112_spill] sm:$0xff] %v4302_v35  ;;  %4839 = vst [vmem:[#allocation113_spill] sm:$0xff] %v4305_v48  ;;  %v3163_v30 = vld [vmem:[#allocation4 + $0x10] ss:$24 sps:$4 sm:$0xff]   ;;  %v3168_v36 = vld [vmem:[#allocation7 + $0x4] ss:$24 sps:$4 sm:$0xff]  }
 0x12e   : > { %1650 = vmatpush1.bf16.msra.mxu0 %v4286_v37  ;;  %1779 = vmatpush1.bf16.msra.mxu1 %v4289_v34  ;;  %v3175_v37 = vld [vmem:[%s3663_s9 + $0x4] ss:$16 sps:$4 sm:$0xff]   ;;  %v3176_v34 = vld [vmem:[%s3663_s9 + $0xc] ss:$16 sps:$4 sm:$0xff]  }
 0x12f   : > { %1651 = vmatprep.subr.bf16.mxu0 %v4294_v39  ;;  %1780 = vmatprep.subr.bf16.mxu1 %v4297_v40  ;;  %v3177_v39 = vld [vmem:[%s3663_s9] ss:$16 sps:$4 sm:$0xff]   ;;  %v3178_v40 = vld [vmem:[%s3663_s9 + $0x8] ss:$16 sps:$4 sm:$0xff]  }
 0x132   : > { %1652 = vmatpush1.bf16.msra.mxu0 %v4302_v35  ;;  %1781 = vmatpush1.bf16.msra.mxu1 %v4305_v48  ;;  %v3180_v48 = vld [vmem:[%s3663_s9 + $0x2c] ss:$16 sps:$4 sm:$0xff]  }
 0x133   : > { %1853 = vmatprep.subr.bf16.mxu0 %v3175_v37  ;;  %1982 = vmatprep.subr.bf16.mxu1 %v3176_v34  ;;  %v3181_v34 = vld [vmem:[%s3663_s9 + $0x20] ss:$16 sps:$4 sm:$0xff]   ;;  %v3182_v37 = vld [vmem:[%s3663_s9 + $0x28] ss:$16 sps:$4 sm:$0xff]   ;;  %v3212_v35 = vld [vmem:[%s3663_s9 + $0x12c] ss:$16 sps:$4 sm:$0xff]  }
 0x135   : > { %1654 = vmatmul.mubr.bf16.vlgmr.msra.gmra.mrb[0].mxu0 %v3163_v30  ;;  %1783 = vmatmul.mubr.bf16.vlgmr.msra.gmra.mrb[0].mxu1 %v3163_v30  ;;  %v3183_v30 = vld [vmem:[%s3663_s9 + $0x44] ss:$16 sps:$4 sm:$0xff]  }
 0x136   : > { %1854 = vmatpush1.bf16.msra.mxu0 %v3177_v39  ;;  %1983 = vmatpush1.bf16.msra.mxu1 %v3178_v40  ;;  %v3184_v39 = vld [vmem:[%s3663_s9 + $0x4c] ss:$16 sps:$4 sm:$0xff]   ;;  %v3185_v40 = vld [vmem:[%s3663_s9 + $0x40] ss:$16 sps:$4 sm:$0xff]  }
 0x137   : > { %1855 = vmatprep.subr.bf16.mxu0 %v3179_v41  ;;  %1984 = vmatprep.subr.bf16.mxu1 %v3180_v48  ;;  %v3186_v41 = vld [vmem:[%s3663_s9 + $0x48] ss:$16 sps:$4 sm:$0xff]   ;;  %v3187_v48 = vld [vmem:[%s3663_s9 + $0x64] ss:$16 sps:$4 sm:$0xff]  }
 0x138   : > { %1885 = vmatprep.mubr.bf16.mxu0 %v3168_v36  ;;  %2014 = vmatprep.mubr.bf16.mxu1 %v3168_v36  ;;  %v3188_v36 = vld [vmem:[%s3663_s9 + $0x6c] ss:$16 sps:$4 sm:$0xff]  }
 0x13a   : > { %1856 = vmatpush1.bf16.msra.mxu0 %v3181_v34  ;;  %1985 = vmatpush1.bf16.msra.mxu1 %v3182_v37  ;;  %v3189_v34 = vld [vmem:[%s3663_s9 + $0x60] ss:$16 sps:$4 sm:$0xff]   ;;  %v3190_v37 = vld [vmem:[%s3663_s9 + $0x68] ss:$16 sps:$4 sm:$0xff]  }
 0x13b   : > { %1857 = vmatprep.subr.bf16.mxu0 %v3183_v30  ;;  %1986 = vmatprep.subr.bf16.mxu1 %v3184_v39  ;;  %v3191_v30 = vld [vmem:[%s3663_s9 + $0x84] ss:$16 sps:$4 sm:$0xff]   ;;  %v3192_v39 = vld [vmem:[%s3663_s9 + $0x8c] ss:$16 sps:$4 sm:$0xff]  }
 0x13e   : > { %1858 = vmatpush1.bf16.msra.mxu0 %v3185_v40  ;;  %1987 = vmatpush1.bf16.msra.mxu1 %v3186_v41  ;;  %v3193_v40 = vld [vmem:[%s3663_s9 + $0x80] ss:$16 sps:$4 sm:$0xff]   ;;  %v3194_v41 = vld [vmem:[%s3663_s9 + $0x88] ss:$16 sps:$4 sm:$0xff]  }
 0x13f   : > { %1859 = vmatprep.subr.bf16.mxu0 %v3187_v48  ;;  %1988 = vmatprep.subr.bf16.mxu1 %v3188_v36  ;;  %v3195_v48 = vld [vmem:[%s3663_s9 + $0xa4] ss:$16 sps:$4 sm:$0xff]   ;;  %v3196_v36 = vld [vmem:[%s3663_s9 + $0xac] ss:$16 sps:$4 sm:$0xff]  }
 0x142   : > { %1860 = vmatpush1.bf16.msra.mxu0 %v3189_v34  ;;  %1989 = vmatpush1.bf16.msra.mxu1 %v3190_v37  ;;  %v3197_v34 = vld [vmem:[%s3663_s9 + $0xa0] ss:$16 sps:$4 sm:$0xff]   ;;  %v3198_v37 = vld [vmem:[%s3663_s9 + $0xa8] ss:$16 sps:$4 sm:$0xff]  }
 0x143   : > { %1861 = vmatprep.subr.bf16.mxu0 %v3191_v30  ;;  %1990 = vmatprep.subr.bf16.mxu1 %v3192_v39  ;;  %v3199_v30 = vld [vmem:[%s3663_s9 + $0xc4] ss:$16 sps:$4 sm:$0xff]   ;;  %v3200_v39 = vld [vmem:[%s3663_s9 + $0xcc] ss:$16 sps:$4 sm:$0xff]  }
 0x146   : > { %1862 = vmatpush1.bf16.msra.mxu0 %v3193_v40  ;;  %1991 = vmatpush1.bf16.msra.mxu1 %v3194_v41  ;;  %v3201_v40 = vld [vmem:[%s3663_s9 + $0xc0] ss:$16 sps:$4 sm:$0xff]   ;;  %v3202_v41 = vld [vmem:[%s3663_s9 + $0xc8] ss:$16 sps:$4 sm:$0xff]  }
 0x147   : > { %1863 = vmatprep.subr.bf16.mxu0 %v3195_v48  ;;  %1992 = vmatprep.subr.bf16.mxu1 %v3196_v36  ;;  %v3203_v48 = vld [vmem:[%s3663_s9 + $0xe4] ss:$16 sps:$4 sm:$0xff]   ;;  %v3204_v36 = vld [vmem:[%s3663_s9 + $0xec] ss:$16 sps:$4 sm:$0xff]  }
 0x14a   : > { %1864 = vmatpush1.bf16.msra.mxu0 %v3197_v34  ;;  %1993 = vmatpush1.bf16.msra.mxu1 %v3198_v37  ;;  %v3205_v34 = vld [vmem:[%s3663_s9 + $0xe0] ss:$16 sps:$4 sm:$0xff]   ;;  %v3206_v37 = vld [vmem:[%s3663_s9 + $0xe8] ss:$16 sps:$4 sm:$0xff]  }
 0x14b   : > { %1865 = vmatprep.subr.bf16.mxu0 %v3199_v30  ;;  %1994 = vmatprep.subr.bf16.mxu1 %v3200_v39  ;;  %v3207_v30 = vld [vmem:[%s3663_s9 + $0x104] ss:$16 sps:$4 sm:$0xff]   ;;  %v3208_v39 = vld [vmem:[%s3663_s9 + $0x10c] ss:$16 sps:$4 sm:$0xff]  }
 0x14e   : > { %1866 = vmatpush1.bf16.msra.mxu0 %v3201_v40  ;;  %1995 = vmatpush1.bf16.msra.mxu1 %v3202_v41  ;;  %v3209_v40 = vld [vmem:[%s3663_s9 + $0x100] ss:$16 sps:$4 sm:$0xff]   ;;  %v3210_v41 = vld [vmem:[%s3663_s9 + $0x108] ss:$16 sps:$4 sm:$0xff]  }
 0x14f   : > { %1867 = vmatprep.subr.bf16.mxu0 %v3203_v48  ;;  %1996 = vmatprep.subr.bf16.mxu1 %v3204_v36  ;;  %v3211_v48 = vld [vmem:[%s3663_s9 + $0x124] ss:$16 sps:$4 sm:$0xff]   ;;  %v3213_v36 = vld [vmem:[%s3663_s9 + $0x120] ss:$16 sps:$4 sm:$0xff]  }
 0x152   : > { %1868 = vmatpush1.bf16.msra.mxu0 %v3205_v34  ;;  %1997 = vmatpush1.bf16.msra.mxu1 %v3206_v37  ;;  %v3214_v34 = vld [vmem:[%s3663_s9 + $0x128] ss:$16 sps:$4 sm:$0xff]   ;;  %v3216_v37 = vld [vmem:[%s3663_s9 + $0x14c] ss:$16 sps:$4 sm:$0xff]   ;;  %s3307_s9 = sshll.u32 %s3436_s6, 4  ;;  %s3308_s9 = int_to_ptr.vmem [resolvable:$false] %s3307_s9 }
 0x153   : > { %1869 = vmatprep.subr.bf16.mxu0 %v3207_v30  ;;  %1998 = vmatprep.subr.bf16.mxu1 %v3208_v39  ;;  %v4892_v30 = vld [vmem:[#allocation70_spill] sm:$0xff]  ;;  %v4893_v39 = vld [vmem:[#allocation71_spill] sm:$0xff]  ;;  %s3309_s21 = scalar_lea.vmem %s3308_s9, 256  ;;  %p3310_p8 = scmp.lt.s32.totalorder %s4551_s7, %s3308_s9 }
 0x154   : > { %p3311_p11 = scmp.lt.s32.totalorder %s3309_s21, %s3303_s28 }
 0x156   : > { %1870 = vmatpush1.bf16.msra.mxu0 %v3209_v40  ;;  %1999 = vmatpush1.bf16.msra.mxu1 %v3210_v41  ;;  %v4894_v40 = vld [vmem:[#allocation72_spill] sm:$0xff]  ;;  %v4895_v41 = vld [vmem:[#allocation73_spill] sm:$0xff]  ;;  %p3312_p13 = por %p3311_p11, %p3310_p8 }
 0x157   : > { %1871 = vmatprep.subr.bf16.mxu0 %v3211_v48  ;;  %2000 = vmatprep.subr.bf16.mxu1 %v3212_v35  ;;  %v4891_v35 = vld [vmem:[#allocation69_spill] sm:$0xff]  ;;  %v4896_v48 = vld [vmem:[#allocation74_spill] sm:$0xff] }
 0x158   : > { %p3313_p0 = pnand %p3312_p13, %p3306_p1 }
 0x15a   : > { %1872 = vmatpush1.bf16.msra.mxu0 %v3213_v36  ;;  %2001 = vmatpush1.bf16.msra.mxu1 %v3214_v34  ;;  %v4897_v36 = vld [vmem:[#allocation75_spill] sm:$0xff]  ;;  %v4898_v34 = vld [vmem:[#allocation76_spill] sm:$0xff] }
 0x15b   : > { %1873 = vmatprep.subr.bf16.mxu0 %v3215_v38  ;;  %2002 = vmatprep.subr.bf16.mxu1 %v3216_v37  ;;  %v4889_v38 = vld [vmem:[#allocation67_spill] sm:$0xff]  ;;  %v4899_v37 = vld [vmem:[#allocation77_spill] sm:$0xff] }
 0x15e   : > { %1874 = vmatpush1.bf16.msra.mxu0 %v3712_v42  ;;  %2003 = vmatpush1.bf16.msra.mxu1 %v3715_v43  ;;  %v3166_v42 = vld [vmem:[#allocation7] ss:$24 sps:$4 sm:$0xff]   ;;  %v3171_v43 = vld [vmem:[#allocation7 + $0xc] ss:$24 sps:$4 sm:$0xff]  }
 0x15f   : > { %1875 = vmatprep.subr.bf16.mxu0 %v3718_v44  ;;  %2004 = vmatprep.subr.bf16.mxu1 %v3721_v45  ;;  %v4840_v44 = vld [vmem:[#allocation18_spill] sm:$0xff]  ;;  %v4841_v45 = vld [vmem:[#allocation19_spill] sm:$0xff] }
 0x162   : > { %1876 = vmatpush1.bf16.msra.mxu0 %v3724_v46  ;;  %2005 = vmatpush1.bf16.msra.mxu1 %v3727_v47  ;;  %v4842_v46 = vld [vmem:[#allocation20_spill] sm:$0xff]  ;;  %v4843_v47 = vld [vmem:[#allocation21_spill] sm:$0xff] }
 0x163   : > { %1877 = vmatprep.subr.bf16.mxu0 %v3732_v49  ;;  %2006 = vmatprep.subr.bf16.mxu1 %v3737_v50  ;;  %v4844_v49 = vld [vmem:[#allocation22_spill] sm:$0xff]  ;;  %v4845_v50 = vld [vmem:[#allocation23_spill] sm:$0xff] }
 0x166   : > { %1878 = vmatpush1.bf16.msra.mxu0 %v3740_v51  ;;  %2007 = vmatpush1.bf16.msra.mxu1 %v3743_v52  ;;  %v4846_v51 = vld [vmem:[#allocation24_spill] sm:$0xff]  ;;  %v4847_v52 = vld [vmem:[#allocation25_spill] sm:$0xff] }
 0x167   : > { %1879 = vmatprep.subr.bf16.mxu0 %v3748_v53  ;;  %2008 = vmatprep.subr.bf16.mxu1 %v3753_v54  ;;  %v4848_v53 = vld [vmem:[#allocation26_spill] sm:$0xff]  ;;  %v4849_v54 = vld [vmem:[#allocation27_spill] sm:$0xff] }
 0x16a   : > { %1880 = vmatpush1.bf16.msra.mxu0 %v3756_v55  ;;  %2009 = vmatpush1.bf16.msra.mxu1 %v3759_v56  ;;  %v4850_v55 = vld [vmem:[#allocation28_spill] sm:$0xff]  ;;  %v4851_v56 = vld [vmem:[#allocation29_spill] sm:$0xff] }
 0x16b   : > { %1881 = vmatprep.subr.bf16.mxu0 %v3764_v57  ;;  %2010 = vmatprep.subr.bf16.mxu1 %v3769_v58  ;;  %v4852_v57 = vld [vmem:[#allocation30_spill] sm:$0xff]  ;;  %v4853_v58 = vld [vmem:[#allocation31_spill] sm:$0xff] }
 0x16e   : > { %1882 = vmatpush1.bf16.msra.mxu0 %v3772_v59  ;;  %2011 = vmatpush1.bf16.msra.mxu1 %v3775_v60  ;;  %v4854_v59 = vld [vmem:[#allocation32_spill] sm:$0xff]  ;;  %v4855_v60 = vld [vmem:[#allocation33_spill] sm:$0xff] }
 0x16f   : > { %1883 = vmatprep.subr.bf16.mxu0 %v3780_v61  ;;  %2012 = vmatprep.subr.bf16.mxu1 %v3785_v62  ;;  %v4856_v61 = vld [vmem:[#allocation34_spill] sm:$0xff]  ;;  %v4857_v62 = vld [vmem:[#allocation35_spill] sm:$0xff] }
 0x172   : > { %1884 = vmatpush1.bf16.msra.mxu0 %v3788_v63  ;;  %2013 = vmatpush1.bf16.msra.mxu1 %v3791_v0  ;;  %v4858_v63 = vld [vmem:[#allocation36_spill] sm:$0xff]  ;;  %v4859_v0 = vld [vmem:[#allocation37_spill] sm:$0xff] }
 0x173   : > { %1896 = vmatprep.subr.bf16.mxu0 %v3796_v1  ;;  %2025 = vmatprep.subr.bf16.mxu1 %v3801_v2  ;;  %v4860_v1 = vld [vmem:[#allocation38_spill] sm:$0xff]  ;;  %v4861_v2 = vld [vmem:[#allocation39_spill] sm:$0xff] }
 0x175   : > { %1886 = vmatmul.mubr.bf16.vlgmr.msra.gmra.mrb[4].mxu0 %v3166_v42  ;;  %2015 = vmatmul.mubr.bf16.vlgmr.msra.gmra.mrb[4].mxu1 %v3166_v42  ;;  %v4900_v42 = vld [vmem:[#allocation78_spill] sm:$0xff] }
 0x176   : > { %1897 = vmatpush1.bf16.msra.mxu0 %v3804_v4  ;;  %2026 = vmatpush1.bf16.msra.mxu1 %v3807_v5  ;;  %v4862_v4 = vld [vmem:[#allocation40_spill] sm:$0xff]  ;;  %v4863_v5 = vld [vmem:[#allocation41_spill] sm:$0xff] }
 0x177   : > { %1898 = vmatprep.subr.bf16.mxu0 %v3812_v6  ;;  %2027 = vmatprep.subr.bf16.mxu1 %v3817_v7  ;;  %v4864_v6 = vld [vmem:[#allocation42_spill] sm:$0xff]  ;;  %v4865_v7 = vld [vmem:[#allocation43_spill] sm:$0xff] }
 0x178   : > { %1928 = vmatprep.mubr.bf16.mxu0 %v3171_v43  ;;  %2057 = vmatprep.mubr.bf16.mxu1 %v3171_v43  ;;  %v4901_v43 = vld [vmem:[#allocation79_spill] sm:$0xff] }
 0x17a   : > { %1899 = vmatpush1.bf16.msra.mxu0 %v3820_v8  ;;  %2028 = vmatpush1.bf16.msra.mxu1 %v3823_v9  ;;  %v4866_v8 = vld [vmem:[#allocation44_spill] sm:$0xff]  ;;  %v4867_v9 = vld [vmem:[#allocation45_spill] sm:$0xff] }
 0x17b   : > { %1900 = vmatprep.subr.bf16.mxu0 %v3828_v10  ;;  %2029 = vmatprep.subr.bf16.mxu1 %v3833_v11  ;;  %v4868_v10 = vld [vmem:[#allocation46_spill] sm:$0xff]  ;;  %v4869_v11 = vld [vmem:[#allocation47_spill] sm:$0xff] }
 0x17e   : > { %1901 = vmatpush1.bf16.msra.mxu0 %v3836_v12  ;;  %2030 = vmatpush1.bf16.msra.mxu1 %v3839_v13  ;;  %v4870_v12 = vld [vmem:[#allocation48_spill] sm:$0xff] }
 0x17f   : > { %1902 = vmatprep.subr.bf16.mxu0 %v3844_v14  ;;  %2031 = vmatprep.subr.bf16.mxu1 %v3849_v15  ;;  %v3169_v13 = vld [vmem:[#allocation7 + $0x8] ss:$24 sps:$4 sm:$0xff]   ;;  %v4872_v15 = vld [vmem:[#allocation50_spill] sm:$0xff] }
 0x180   : > { %v4871_v14 = vld [vmem:[#allocation49_spill] sm:$0xff] }
 0x182   : > { %1903 = vmatpush1.bf16.msra.mxu0 %v3852_v16  ;;  %2032 = vmatpush1.bf16.msra.mxu1 %v3855_v17  ;;  %v4873_v16 = vld [vmem:[#allocation51_spill] sm:$0xff]  ;;  %v3174_v17 = vld [vmem:[#allocation7 + $0x14] ss:$24 sps:$4 sm:$0xff]  }
 0x183   : > { %1904 = vmatprep.subr.bf16.mxu0 %v3860_v18  ;;  %2033 = vmatprep.subr.bf16.mxu1 %v3865_v19  ;;  %v4874_v18 = vld [vmem:[#allocation52_spill] sm:$0xff]  ;;  %v4875_v19 = vld [vmem:[#allocation53_spill] sm:$0xff] }
 0x186   : > { %1905 = vmatpush1.bf16.msra.mxu0 %v3868_v20  ;;  %2034 = vmatpush1.bf16.msra.mxu1 %v3871_v21  ;;  %v4876_v20 = vld [vmem:[#allocation54_spill] sm:$0xff]  ;;  %v4877_v21 = vld [vmem:[#allocation55_spill] sm:$0xff] }
 0x187   : > { %1906 = vmatprep.subr.bf16.mxu0 %v3876_v22  ;;  %2035 = vmatprep.subr.bf16.mxu1 %v3881_v23  ;;  %v4878_v22 = vld [vmem:[#allocation56_spill] sm:$0xff]  ;;  %v4879_v23 = vld [vmem:[#allocation57_spill] sm:$0xff] }
 0x18a   : > { %1907 = vmatpush1.bf16.msra.mxu0 %v3884_v24  ;;  %2036 = vmatpush1.bf16.msra.mxu1 %v3887_v25  ;;  %v4880_v24 = vld [vmem:[#allocation58_spill] sm:$0xff]  ;;  %v4881_v25 = vld [vmem:[#allocation59_spill] sm:$0xff] }
 0x18b   : > { %1908 = vmatprep.subr.bf16.mxu0 %v3892_v26  ;;  %2037 = vmatprep.subr.bf16.mxu1 %v3897_v27  ;;  %v4882_v26 = vld [vmem:[#allocation60_spill] sm:$0xff]  ;;  %v4883_v27 = vld [vmem:[#allocation61_spill] sm:$0xff] }
 0x18e   : > { %1909 = vmatpush1.bf16.msra.mxu0 %v3900_v28  ;;  %2038 = vmatpush1.bf16.msra.mxu1 %v3903_v29  ;;  %v4884_v28 = vld [vmem:[#allocation62_spill] sm:$0xff]  ;;  %v4885_v29 = vld [vmem:[#allocation63_spill] sm:$0xff] }
 0x18f   : > { %1910 = vmatprep.subr.bf16.mxu0 %v3908_v31  ;;  %2039 = vmatprep.subr.bf16.mxu1 %v3913_v32  ;;  %v4886_v31 = vld [vmem:[#allocation64_spill] sm:$0xff]  ;;  %v4887_v32 = vld [vmem:[#allocation65_spill] sm:$0xff] }
 0x192   : > { %1911 = vmatpush1.bf16.msra.mxu0 %v3916_v33  ;;  %2040 = vmatpush1.bf16.msra.mxu1 %v4840_v44  ;;  %v4888_v33 = vld [vmem:[#allocation66_spill] sm:$0xff]  ;;  %v4902_v44 = vld [vmem:[#allocation80_spill] sm:$0xff] }
 0x193   : > { %1912 = vmatprep.subr.bf16.mxu0 %v4841_v45  ;;  %2041 = vmatprep.subr.bf16.mxu1 %v4842_v46  ;;  %v4903_v45 = vld [vmem:[#allocation81_spill] sm:$0xff]  ;;  %v4904_v46 = vld [vmem:[#allocation82_spill] sm:$0xff] }
 0x196   : > { %1913 = vmatpush1.bf16.msra.mxu0 %v4843_v47  ;;  %2042 = vmatpush1.bf16.msra.mxu1 %v4844_v49  ;;  %v4905_v47 = vld [vmem:[#allocation83_spill] sm:$0xff]  ;;  %v4906_v49 = vld [vmem:[#allocation84_spill] sm:$0xff] }
 0x197   : > { %1914 = vmatprep.subr.bf16.mxu0 %v4845_v50  ;;  %2043 = vmatprep.subr.bf16.mxu1 %v4846_v51  ;;  %v4907_v50 = vld [vmem:[#allocation85_spill] sm:$0xff]  ;;  %v4908_v51 = vld [vmem:[#allocation86_spill] sm:$0xff] }
 0x19a   : > { %1915 = vmatpush1.bf16.msra.mxu0 %v4847_v52  ;;  %2044 = vmatpush1.bf16.msra.mxu1 %v4848_v53  ;;  %v4909_v52 = vld [vmem:[#allocation87_spill] sm:$0xff]  ;;  %v4910_v53 = vld [vmem:[#allocation88_spill] sm:$0xff] }
 0x19b   : > { %1916 = vmatprep.subr.bf16.mxu0 %v4849_v54  ;;  %2045 = vmatprep.subr.bf16.mxu1 %v4850_v55  ;;  %v4911_v54 = vld [vmem:[#allocation89_spill] sm:$0xff]  ;;  %v4912_v55 = vld [vmem:[#allocation90_spill] sm:$0xff] }
 0x19e   : > { %1917 = vmatpush1.bf16.msra.mxu0 %v4851_v56  ;;  %2046 = vmatpush1.bf16.msra.mxu1 %v4852_v57  ;;  %v4913_v56 = vld [vmem:[#allocation91_spill] sm:$0xff]  ;;  %v4914_v57 = vld [vmem:[#allocation92_spill] sm:$0xff] }
 0x19f   : > { %1918 = vmatprep.subr.bf16.mxu0 %v4853_v58  ;;  %2047 = vmatprep.subr.bf16.mxu1 %v4854_v59  ;;  %v4915_v58 = vld [vmem:[#allocation93_spill] sm:$0xff]  ;;  %v4916_v59 = vld [vmem:[#allocation94_spill] sm:$0xff] }
 0x1a2   : > { %1919 = vmatpush1.bf16.msra.mxu0 %v4855_v60  ;;  %2048 = vmatpush1.bf16.msra.mxu1 %v4856_v61  ;;  %v4917_v60 = vld [vmem:[#allocation95_spill] sm:$0xff]  ;;  %v4918_v61 = vld [vmem:[#allocation96_spill] sm:$0xff] }
 0x1a3   : > { %1920 = vmatprep.subr.bf16.mxu0 %v4857_v62  ;;  %2049 = vmatprep.subr.bf16.mxu1 %v4858_v63  ;;  %v4919_v62 = vld [vmem:[#allocation97_spill] sm:$0xff]  ;;  %v4920_v63 = vld [vmem:[#allocation98_spill] sm:$0xff] }
 0x1a6   : > { %1921 = vmatpush1.bf16.msra.mxu0 %v4859_v0  ;;  %2050 = vmatpush1.bf16.msra.mxu1 %v4860_v1  ;;  %v4921_v0 = vld [vmem:[#allocation99_spill] sm:$0xff]  ;;  %v4922_v1 = vld [vmem:[#allocation100_spill] sm:$0xff] }
 0x1a7   : > { %1922 = vmatprep.subr.bf16.mxu0 %v4861_v2  ;;  %2051 = vmatprep.subr.bf16.mxu1 %v4862_v4  ;;  %v4923_v2 = vld [vmem:[#allocation101_spill] sm:$0xff]  ;;  %v4924_v4 = vld [vmem:[#allocation102_spill] sm:$0xff] }
 0x1aa   : > { %1923 = vmatpush1.bf16.msra.mxu0 %v4863_v5  ;;  %2052 = vmatpush1.bf16.msra.mxu1 %v4864_v6  ;;  %v4925_v5 = vld [vmem:[#allocation103_spill] sm:$0xff]  ;;  %v4926_v6 = vld [vmem:[#allocation104_spill] sm:$0xff] }
 0x1ab   : > { %1924 = vmatprep.subr.bf16.mxu0 %v4865_v7  ;;  %2053 = vmatprep.subr.bf16.mxu1 %v4866_v8  ;;  %v4927_v7 = vld [vmem:[#allocation105_spill] sm:$0xff]  ;;  %v4928_v8 = vld [vmem:[#allocation106_spill] sm:$0xff] }
 0x1ae   : > { %1925 = vmatpush1.bf16.msra.mxu0 %v4867_v9  ;;  %2054 = vmatpush1.bf16.msra.mxu1 %v4868_v10  ;;  %v4929_v9 = vld [vmem:[#allocation107_spill] sm:$0xff]  ;;  %v4930_v10 = vld [vmem:[#allocation108_spill] sm:$0xff] }
 0x1af   : > { %1926 = vmatprep.subr.bf16.mxu0 %v4869_v11  ;;  %2055 = vmatprep.subr.bf16.mxu1 %v4870_v12  ;;  %v4931_v11 = vld [vmem:[#allocation109_spill] sm:$0xff]  ;;  %v4932_v12 = vld [vmem:[#allocation110_spill] sm:$0xff] }
 0x1b2   : > { %1927 = vmatpush1.bf16.msra.mxu0 %v4871_v14  ;;  %2056 = vmatpush1.bf16.msra.mxu1 %v4047_v3  ;;  %v4890_v3 = vld [vmem:[#allocation68_spill] sm:$0xff]  ;;  %v3172_v14 = vld [vmem:[#allocation7 + $0x10] ss:$24 sps:$4 sm:$0xff]  }
 0x1b3   : > { %1939 = vmatprep.subr.bf16.mxu0 %v4872_v15  ;;  %2068 = vmatprep.subr.bf16.mxu1 %v4873_v16  ;;  %v4934_v15 = vld [vmem:[#allocation112_spill] sm:$0xff]  ;;  %v4935_v16 = vld [vmem:[#allocation113_spill] sm:$0xff] }
 0x1b5   : > { %1929 = vmatmul.mubr.bf16.vlgmr.msra.gmra.mrb[4].mxu0 %v3169_v13  ;;  %2058 = vmatmul.mubr.bf16.vlgmr.msra.gmra.mrb[4].mxu1 %v3169_v13  ;;  %v4933_v13 = vld [vmem:[#allocation111_spill] sm:$0xff] }
 0x1b6   : > { %1940 = vmatpush1.bf16.msra.mxu0 %v4874_v18  ;;  %2069 = vmatpush1.bf16.msra.mxu1 %v4875_v19 }
 0x1b7   : > { %1941 = vmatprep.subr.bf16.mxu0 %v4876_v20  ;;  %2070 = vmatprep.subr.bf16.mxu1 %v4877_v21 }
 0x1b8   : > { %1971 = vmatprep.mubr.bf16.mxu0 %v3174_v17  ;;  %2100 = vmatprep.mubr.bf16.mxu1 %v3174_v17 }
 0x1ba   : > { %1942 = vmatpush1.bf16.msra.mxu0 %v4878_v22  ;;  %2071 = vmatpush1.bf16.msra.mxu1 %v4879_v23 }
 0x1bb   : > { %1943 = vmatprep.subr.bf16.mxu0 %v4880_v24  ;;  %2072 = vmatprep.subr.bf16.mxu1 %v4881_v25 }
 0x1be   : > { %1944 = vmatpush1.bf16.msra.mxu0 %v4882_v26  ;;  %2073 = vmatpush1.bf16.msra.mxu1 %v4883_v27 }
 0x1bf   : > { %1945 = vmatprep.subr.bf16.mxu0 %v4884_v28  ;;  %2074 = vmatprep.subr.bf16.mxu1 %v4885_v29 }
 0x1c2   : > { %1946 = vmatpush1.bf16.msra.mxu0 %v4886_v31  ;;  %2075 = vmatpush1.bf16.msra.mxu1 %v4887_v32 }
 0x1c3   : > { %1947 = vmatprep.subr.bf16.mxu0 %v4888_v33  ;;  %2076 = vmatprep.subr.bf16.mxu1 %v4889_v38 }
 0x1c6   : > { %1948 = vmatpush1.bf16.msra.mxu0 %v4890_v3  ;;  %2077 = vmatpush1.bf16.msra.mxu1 %v4891_v35 }
 0x1c7   : > { %1949 = vmatprep.subr.bf16.mxu0 %v4892_v30  ;;  %2078 = vmatprep.subr.bf16.mxu1 %v4893_v39 }
 0x1ca   : > { %1950 = vmatpush1.bf16.msra.mxu0 %v4894_v40  ;;  %2079 = vmatpush1.bf16.msra.mxu1 %v4895_v41 }
 0x1cb   : > { %1951 = vmatprep.subr.bf16.mxu0 %v4896_v48  ;;  %2080 = vmatprep.subr.bf16.mxu1 %v4897_v36 }
 0x1ce   : > { %1952 = vmatpush1.bf16.msra.mxu0 %v4898_v34  ;;  %2081 = vmatpush1.bf16.msra.mxu1 %v4899_v37 }
 0x1cf   : > { %1953 = vmatprep.subr.bf16.mxu0 %v4900_v42  ;;  %2082 = vmatprep.subr.bf16.mxu1 %v4901_v43 }
 0x1d2   : > { %1954 = vmatpush1.bf16.msra.mxu0 %v4902_v44  ;;  %2083 = vmatpush1.bf16.msra.mxu1 %v4903_v45 }
 0x1d3   : > { %1955 = vmatprep.subr.bf16.mxu0 %v4904_v46  ;;  %2084 = vmatprep.subr.bf16.mxu1 %v4905_v47 }
 0x1d6   : > { %1956 = vmatpush1.bf16.msra.mxu0 %v4906_v49  ;;  %2085 = vmatpush1.bf16.msra.mxu1 %v4907_v50 }
 0x1d7   : > { %1957 = vmatprep.subr.bf16.mxu0 %v4908_v51  ;;  %2086 = vmatprep.subr.bf16.mxu1 %v4909_v52 }
 0x1da   : > { %1958 = vmatpush1.bf16.msra.mxu0 %v4910_v53  ;;  %2087 = vmatpush1.bf16.msra.mxu1 %v4911_v54 }
 0x1db   : > { %1959 = vmatprep.subr.bf16.mxu0 %v4912_v55  ;;  %2088 = vmatprep.subr.bf16.mxu1 %v4913_v56 }
 0x1de   : > { %1960 = vmatpush1.bf16.msra.mxu0 %v4914_v57  ;;  %2089 = vmatpush1.bf16.msra.mxu1 %v4915_v58 }
 0x1df   : > { %1961 = vmatprep.subr.bf16.mxu0 %v4916_v59  ;;  %2090 = vmatprep.subr.bf16.mxu1 %v4917_v60 }
 0x1e2   : > { %1962 = vmatpush1.bf16.msra.mxu0 %v4918_v61  ;;  %2091 = vmatpush1.bf16.msra.mxu1 %v4919_v62 }
 0x1e3   : > { %1963 = vmatprep.subr.bf16.mxu0 %v4920_v63  ;;  %2092 = vmatprep.subr.bf16.mxu1 %v4921_v0 }
 0x1e6   : > { %1964 = vmatpush1.bf16.msra.mxu0 %v4922_v1  ;;  %2093 = vmatpush1.bf16.msra.mxu1 %v4923_v2 }
 0x1e7   : > { %1965 = vmatprep.subr.bf16.mxu0 %v4924_v4  ;;  %2094 = vmatprep.subr.bf16.mxu1 %v4925_v5 }
 0x1ea   : > { %1966 = vmatpush1.bf16.msra.mxu0 %v4926_v6  ;;  %2095 = vmatpush1.bf16.msra.mxu1 %v4927_v7 }
 0x1eb   : > { %1967 = vmatprep.subr.bf16.mxu0 %v4928_v8  ;;  %2096 = vmatprep.subr.bf16.mxu1 %v4929_v9  ;;  %v3435_v9 = vmov 1983009808  }
 0x1ee   : > { %1968 = vmatpush1.bf16.msra.mxu0 %v4930_v10  ;;  %2097 = vmatpush1.bf16.msra.mxu1 %v4931_v11  ;;  %v2215_v10 = vunpack.c.l.s4 %v3435_v9  ;;  %v2217_v11 = vlaneseq }
 0x1ef   : > { %1969 = vmatprep.subr.bf16.mxu0 %v4932_v12  ;;  %2098 = vmatprep.subr.bf16.mxu1 %v4933_v13 }
 0x1f2   : > { %1970 = vmatpush1.bf16.msra.mxu0 %v4934_v15  ;;  %2099 = vmatpush1.bf16.msra.mxu1 %v4935_v16 }
 0x1f5   : > { %1972 = vmatmul.mubr.bf16.vlgmr.msra.gmra.mrb[4].mxu0 %v3172_v14  ;;  %2101 = vmatmul.mubr.bf16.vlgmr.msra.gmra.mrb[4].mxu1 %v3172_v14 }
 0x208   : > { %v1655_v17 = vpop.f32.mrb[0].mxu0  ;;  %v1784_v18 = vpop.f32.mrb[0].mxu1 }
 0x209   : > { %v1657_v19 = vpop.f32.mrb[1].mxu0  ;;  %v1786_v20 = vpop.f32.mrb[1].mxu1  ;;  %v2233_v21 = vmul.f32 %v1655_v17, %v1655_v17  ;;  %v2235_v22 = vmul.f32 %v1784_v18, %v1784_v18 }
 0x20a   : > { %v2234_v23 = vmul.f32 %v1657_v19, %v1657_v19  ;;  %v2236_v24 = vmul.f32 %v1786_v20, %v1786_v20  ;;  %v1659_v25 = vpop.f32.mrb[2].mxu0  ;;  %v1788_v26 = vpop.f32.mrb[2].mxu1 }
 0x20b   : > { %v2147_v27 = vadd.f32 %v1659_v25, %v1655_v17  ;;  %v2237_v28 = vmul.f32 %v1659_v25, %v1659_v25  ;;  %v2161_v29 = vadd.f32 %v1788_v26, %v1784_v18  ;;  %v2239_v31 = vmul.f32 %v1788_v26, %v1788_v26  ;;  %v1661_v32 = vpop.f32.mrb[3].mxu0  ;;  %v1790_v33 = vpop.f32.mrb[3].mxu1 }
 0x20c   : > { %v2154_v38 = vadd.f32 %v1661_v32, %v1657_v19  ;;  %v2238_v3 = vmul.f32 %v1661_v32, %v1661_v32  ;;  %v2168_v35 = vadd.f32 %v1790_v33, %v1786_v20  ;;  %v2240_v30 = vmul.f32 %v1790_v33, %v1790_v33 }
 0x20d   : > { %v2241_v39 = vadd.f32 %v2237_v28, %v2233_v21  ;;  %v2255_v40 = vadd.f32 %v2239_v31, %v2235_v22  ;;  %v2148_v36 = vrot.slane %v2147_v27, 4  ;;  %v2162_v34 = vrot.slane %v2161_v29, 4 }
 0x20e   : > { %v2248_v41 = vadd.f32 %v2238_v3, %v2234_v23  ;;  %v2262_v48 = vadd.f32 %v2240_v30, %v2236_v24  ;;  %v2155_v43 = vrot.slane %v2154_v38, 4  ;;  %v2169_v44 = vrot.slane %v2168_v35, 4 }
 0x20f   : > { %v2242_v37 = vrot.slane %v2241_v39, 4  ;;  %v2256_v42 = vrot.slane %v2255_v40, 4  ;;  %v2149_v47 = vadd.f32 %v2148_v36, %v2147_v27  ;;  %v2163_v49 = vadd.f32 %v2162_v34, %v2161_v29 }
 0x210   : > { %v2249_v45 = vrot.slane %v2248_v41, 4  ;;  %v2263_v46 = vrot.slane %v2262_v48, 4  ;;  %v2156_v52 = vadd.f32 %v2155_v43, %v2154_v38  ;;  %v2170_v53 = vadd.f32 %v2169_v44, %v2168_v35 }
 0x211   : > { %v2243_v50 = vadd.f32 %v2242_v37, %v2241_v39  ;;  %v2257_v51 = vadd.f32 %v2256_v42, %v2255_v40  ;;  %v2150_v56 = vrot.slane %v2149_v47, 2  ;;  %v2164_v57 = vrot.slane %v2163_v49, 2 }
 0x212   : > { %v2250_v54 = vadd.f32 %v2249_v45, %v2248_v41  ;;  %v2264_v55 = vadd.f32 %v2263_v46, %v2262_v48  ;;  %v2157_v60 = vrot.slane %v2156_v52, 2  ;;  %v2171_v61 = vrot.slane %v2170_v53, 2 }
 0x213   : > { %v2244_v58 = vrot.slane %v2243_v50, 2  ;;  %v2258_v59 = vrot.slane %v2257_v51, 2  ;;  %v2151_v0 = vadd.f32 %v2150_v56, %v2149_v47  ;;  %v2165_v1 = vadd.f32 %v2164_v57, %v2163_v49 }
 0x214   : > { %v2251_v62 = vrot.slane %v2250_v54, 2  ;;  %v2265_v63 = vrot.slane %v2264_v55, 2  ;;  %v2158_v5 = vadd.f32 %v2157_v60, %v2156_v52  ;;  %v2172_v6 = vadd.f32 %v2171_v61, %v2170_v53 }
 0x215   : > { %v2245_v2 = vadd.f32 %v2244_v58, %v2243_v50  ;;  %v2259_v4 = vadd.f32 %v2258_v59, %v2257_v51  ;;  %v2152_v12 = vrot.slane %v2151_v0, 1  ;;  %v2166_v13 = vrot.slane %v2165_v1, 1 }
 0x216   : > { %v2252_v7 = vadd.f32 %v2251_v62, %v2250_v54  ;;  %v2266_v8 = vadd.f32 %v2265_v63, %v2264_v55  ;;  %v2159_v16 = vrot.slane %v2158_v5, 1  ;;  %v2173_v17 = vrot.slane %v2172_v6, 1 }
 0x217   : > { %v2246_v14 = vrot.slane %v2245_v2, 1  ;;  %v2260_v15 = vrot.slane %v2259_v4, 1  ;;  %v2216_v20 = vunpack.c.0.s8 %v2215_v10  ;;  %v2218_v21 = vshrl.u32 %v2217_v11, 7 }
 0x218   : > { %v2253_v18 = vrot.slane %v2252_v7, 1  ;;  %v2267_v19 = vrot.slane %v2266_v8, 1  ;;  %v4503_v22 = vadd.f32 %v2152_v12, %v2151_v0  ;;  %v4507_v24 = vadd.f32 %v2166_v13, %v2165_v1 }
 0x219   : > { %v4505_v23 = vadd.f32 %v2246_v14, %v2245_v2  ;;  %v4509_v25 = vadd.f32 %v2159_v16, %v2158_v5  ;;  %v4511_v26 = vadd.f32 %v2173_v17, %v2172_v6  ;;  %v4513_v29 = vadd.f32 %v2260_v15, %v2259_v4 }
 0x21a   : > { %v4515_v31 = vadd.f32 %v2253_v18, %v2252_v7  ;;  %v4517_v32 = vadd.f32 %v2267_v19, %v2266_v8  ;;  %v4519_v3 = vsub.s32 %v2216_v20, %v2218_v21 }
 0x2c8   : > { %v1973_v27 = vpop.f32.mrb[4].mxu0  ;;  %v2102_v28 = vpop.f32.mrb[4].mxu1 }
 0x2c9   : > { %v1975_v33 = vpop.f32.mrb[5].mxu0  ;;  %v2104_v38 = vpop.f32.mrb[5].mxu1  ;;  %v2269_v35 = vmul.f32 %v1973_v27, %v1973_v27  ;;  %v2271_v30 = vmul.f32 %v2102_v28, %v2102_v28 }
 0x2ca   : > { %v2270_v39 = vmul.f32 %v1975_v33, %v1975_v33  ;;  %v2272_v40 = vmul.f32 %v2104_v38, %v2104_v38  ;;  %v1977_v41 = vpop.f32.mrb[6].mxu0  ;;  %v2106_v48 = vpop.f32.mrb[6].mxu1 }
 0x2cb   : > { %v2175_v36 = vadd.f32 %v1977_v41, %v1973_v27  ;;  %v2273_v34 = vmul.f32 %v1977_v41, %v1977_v41  ;;  %v2189_v37 = vadd.f32 %v2106_v48, %v2102_v28  ;;  %v2275_v42 = vmul.f32 %v2106_v48, %v2106_v48  ;;  %v1979_v43 = vpop.f32.mrb[7].mxu0  ;;  %v2108_v44 = vpop.f32.mrb[7].mxu1 }
 0x2cc   : > { %v2182_v45 = vadd.f32 %v1979_v43, %v1975_v33  ;;  %v2274_v46 = vmul.f32 %v1979_v43, %v1979_v43  ;;  %v2196_v47 = vadd.f32 %v2108_v44, %v2104_v38  ;;  %v2276_v49 = vmul.f32 %v2108_v44, %v2108_v44 }
 0x2cd   : > { %v2176_v50 = vrot.slane %v2175_v36, 4  ;;  %v2277_v51 = vadd.f32 %v2273_v34, %v2269_v35  ;;  %v2190_v52 = vrot.slane %v2189_v37, 4  ;;  %v2291_v53 = vadd.f32 %v2275_v42, %v2271_v30 }
 0x2ce   : > { %v2183_v54 = vrot.slane %v2182_v45, 4  ;;  %v2284_v55 = vadd.f32 %v2274_v46, %v2270_v39  ;;  %v2197_v56 = vrot.slane %v2196_v47, 4  ;;  %v2298_v57 = vadd.f32 %v2276_v49, %v2272_v40 }
 0x2cf   : > { %v2177_v58 = vadd.f32 %v2176_v50, %v2175_v36  ;;  %v2278_v59 = vrot.slane %v2277_v51, 4  ;;  %v2191_v60 = vadd.f32 %v2190_v52, %v2189_v37  ;;  %v2292_v61 = vrot.slane %v2291_v53, 4 }
 0x2d0   : > { %v2184_v62 = vadd.f32 %v2183_v54, %v2182_v45  ;;  %v2285_v63 = vrot.slane %v2284_v55, 4  ;;  %v2198_v0 = vadd.f32 %v2197_v56, %v2196_v47  ;;  %v2299_v1 = vrot.slane %v2298_v57, 4 }
 0x2d1   : > { %v2178_v2 = vrot.slane %v2177_v58, 2  ;;  %v2279_v4 = vadd.f32 %v2278_v59, %v2277_v51  ;;  %v2192_v5 = vrot.slane %v2191_v60, 2  ;;  %v2293_v6 = vadd.f32 %v2292_v61, %v2291_v53 }
 0x2d2   : > { %v2185_v7 = vrot.slane %v2184_v62, 2  ;;  %v2286_v8 = vadd.f32 %v2285_v63, %v2284_v55  ;;  %v2199_v9 = vrot.slane %v2198_v0, 2  ;;  %v2300_v10 = vadd.f32 %v2299_v1, %v2298_v57 }
 0x2d3   : > { %v2179_v11 = vadd.f32 %v2178_v2, %v2177_v58  ;;  %v2280_v12 = vrot.slane %v2279_v4, 2  ;;  %v2193_v13 = vadd.f32 %v2192_v5, %v2191_v60  ;;  %v2294_v14 = vrot.slane %v2293_v6, 2 }
 0x2d4   : > { %v2186_v15 = vadd.f32 %v2185_v7, %v2184_v62  ;;  %v2287_v16 = vrot.slane %v2286_v8, 2  ;;  %v2200_v17 = vadd.f32 %v2199_v9, %v2198_v0  ;;  %v2301_v18 = vrot.slane %v2300_v10, 2 }
 0x2d5   : > { %v2180_v19 = vrot.slane %v2179_v11, 1  ;;  %v2281_v20 = vadd.f32 %v2280_v12, %v2279_v4  ;;  %v2194_v21 = vrot.slane %v2193_v13, 1  ;;  %v2295_v27 = vadd.f32 %v2294_v14, %v2293_v6 }
 0x2d6   : > { %v2187_v28 = vrot.slane %v2186_v15, 1  ;;  %v2288_v33 = vadd.f32 %v2287_v16, %v2286_v8  ;;  %v2201_v38 = vrot.slane %v2200_v17, 1  ;;  %v2302_v35 = vadd.f32 %v2301_v18, %v2300_v10 }
 0x2d7   : > { %v2181_v30 = vadd.f32 %v2180_v19, %v2179_v11  ;;  %v2282_v39 = vrot.slane %v2281_v20, 1  ;;  %v2195_v40 = vadd.f32 %v2194_v21, %v2193_v13  ;;  %v2296_v41 = vrot.slane %v2295_v27, 1 }
 0x2d8   : > { %v2188_v48 = vadd.f32 %v2187_v28, %v2186_v15  ;;  %v2289_v36 = vrot.slane %v2288_v33, 1  ;;  %v2202_v34 = vadd.f32 %v2201_v38, %v2200_v17  ;;  %v2303_v37 = vrot.slane %v2302_v35, 1 }
 0x2d9   : > { %v2204_v42 = vsel %vm2203_vm0, %v4503_v22, %v2181_v30  ;;  %v2283_v43 = vadd.f32 %v2282_v39, %v2281_v20  ;;  %v2206_v44 = vsel %vm2203_vm0, %v4507_v24, %v2195_v40  ;;  %v2297_v45 = vadd.f32 %v2296_v41, %v2295_v27 }
 0x2da   : > { %v2205_v46 = vsel %vm2203_vm0, %v4509_v25, %v2188_v48  ;;  %v2290_v47 = vadd.f32 %v2289_v36, %v2288_v33  ;;  %v2207_v49 = vsel %vm2203_vm0, %v4511_v26, %v2202_v34  ;;  %v2304_v50 = vadd.f32 %v2303_v37, %v2302_v35 }
 0x2db   : > { %v2305_v51 = vsel %vm2203_vm0, %v4505_v23, %v2283_v43  ;;  %v2307_v22 = vsel %vm2203_vm0, %v4513_v29, %v2297_v45  ;;  %v2212_v52 = vcombine.low %v2204_v42, %v2205_v46  ;;  %v2213_v53 = vcombine.low %v2206_v44, %v2207_v49 }
 0x2dc   : > { %v2306_v24 = vsel %vm2203_vm0, %v4515_v31, %v2290_v47  ;;  %v2308_v54 = vsel %vm2203_vm0, %v4517_v32, %v2304_v50 }
 0x2dd   : > { %v2220_v25 = vrot.slane %v2212_v52, %v4519_v3  ;;  %v2313_v55 = vcombine.low %v2305_v51, %v2306_v24  ;;  %v2227_v26 = vrot.slane %v2213_v53, %v4519_v3  ;;  %v2314_v56 = vcombine.low %v2307_v22, %v2308_v54 }
 0x2df   : > { %v2321_v23 = vrot.slane %v2313_v55, %v4519_v3  ;;  %v2328_v29 = vrot.slane %v2314_v56, %v4519_v3  ;;  %v2228_v57 = vcombine.low %v2220_v25, %v2227_v26 }
 0x2e1   : > { %v2329_v31 = vcombine.low %v2321_v23, %v2328_v29  ;;  %2231 = vst [vmem:[%s296_s22] sm:$0xff] %v2228_v57 }
 0x2e2   : > { %3316 = shalt.err (!%p3313_p0)
}
 0x2e3   : > { %s3317_s25 = scalar_lea.hbm %s4549_s12, 128  ;;  %s3321_s13 = scalar_lea.hbm %s4630_s3, 512 }
 0x2e4   : > { %p3318_p4 = scmp.ne.s32.totalorder %s4549_s12, %s3317_s25  ;;  %p3322_p10 = scmp.lt.u32.totalorder %s4549_s12, %s4630_s3 }
 0x2e5   : > { %p3323_p3 = scmp.lt.u32.totalorder %s3321_s13, %s3317_s25  ;;  %p3325_p2 = scmp.lt.u32.totalorder %s3317_s25, %s4549_s12 }
 0x2e6   : > { %p3319_p9 = pnand %p3318_p4, %p4936_p7 }
 0x2e7   : > { %p3324_p12 = por %p3323_p3, %p3322_p10 }
 0x2e8   : > { %p3320_p5 = pneg %p3319_p9 }
 0x2e9   : > { %p3326_p6 = por %p3325_p2, %p3324_p12 }
 0x2eb   : > { %p3327_p1 = pnand %p3326_p6, %p3320_p5 }
 0x2ed   : > { %3330 = shalt.err (!%p3327_p1)
}
 0x2ee   : > { %2784 = dma.vmem_to_hbm [thread:$0]  (%p4936_p7), %s4551_s7, 128, %s4549_s12, %s2334_s8   ;;  %2332 = vst [vmem:[%s4543_s11] sm:$0xff] %v2329_v31 }
 0x2ef   : > { %s2339_s28 = scalar_lea.sflag [#allocation12], %s3660_s24  ;;  %s3331_s6 = scalar_lea.vmem %s4558_s29, 128 }
 0x2f0   : > { %p3332_p8 = scmp.ne.s32.totalorder %s4558_s29, %s3331_s6  ;;  %s3437_s9 = smov [#allocation11]  }
 0x2f1   : > { %s3335_s21 = sshll.u32 %s3437_s9, 4  ;;  %s3336_s21 = int_to_ptr.vmem [resolvable:$false] %s3335_s21 }
 0x2f2   : > { %p3333_p11 = pnand %p3332_p8, %p4936_p7  ;;  %s3337_s25 = scalar_lea.vmem %s3336_s21, 256 }
 0x2f3   : > { %p3338_p0 = scmp.lt.s32.totalorder %s4558_s29, %s3336_s21  ;;  %p3339_p4 = scmp.lt.s32.totalorder %s3337_s25, %s3331_s6 }
 0x2f4   : > { %p3334_p13 = pneg %p3333_p11 }
 0x2f5   : > { %p3340_p9 = por %p3339_p4, %p3338_p0 }
 0x2f7   : > { %p3341_p5 = pnand %p3340_p9, %p3334_p13 }
 0x2f9   : > { %3344 = shalt.err (!%p3341_p5)
}
 0x2fa   : > { %s3345_s24 = scalar_lea.hbm %s4556_s5, 128  ;;  %s3349_s12 = scalar_lea.hbm %s4631_s4, 512 }
 0x2fb   : > { %p3346_p10 = scmp.ne.s32.totalorder %s4556_s5, %s3345_s24  ;;  %p3350_p2 = scmp.lt.u32.totalorder %s4556_s5, %s4631_s4 }
 0x2fc   : > { %p3351_p6 = scmp.lt.u32.totalorder %s3349_s12, %s3345_s24  ;;  %p3353_p8 = scmp.lt.u32.totalorder %s3345_s24, %s4556_s5 }
 0x2fd   : > { %p3347_p3 = pnand %p3346_p10, %p4936_p7 }
 0x2fe   : > { %p3352_p1 = por %p3351_p6, %p3350_p2 }
 0x2ff   : > { %p3348_p12 = pneg %p3347_p3 }
 0x300   : > { %p3354_p11 = por %p3353_p8, %p3352_p1 }
 0x302   : > { %p3355_p13 = pnand %p3354_p11, %p3348_p12 }
 0x304   : > { %3358 = shalt.err (!%p3355_p13)
}
 0x305   : > { %2785 = dma.vmem_to_hbm [thread:$0]  (%p4936_p7), %s4558_s29, 128, %s4556_s5, %s2339_s28  }
 0x306 PF: > { %p2811_p0 = scmp.ge.s32.totalorder %s3425_s20, 2  ;;  %s2379_s30 = sand.u32 1, %s3405_s15  }
 0x307   : > { %p4937_p4 = scmp.ne.s32.totalorder %s4734_s27, 0  ;;  %s2380_s13 = scalar_lea.sflag [#allocation6], %s2379_s30 }
 0x309   : > { %p2800_p9 = pnand %p2811_p0, %p4937_p4 }
 0x30b   : > { %3396 = dma.done.wait (!%p2800_p9), %s2380_s13, 128  }
 0x30c   : > { %3398 = vsyncadd (!%p2800_p9), %s2380_s13, 4294967168  ;;  %s2389_s18 = scalar_lea.sflag [#allocation12], %s2379_s30 }
 0x30d   : > { %3400 = dma.done.wait (!%p2800_p9), %s2389_s18, 128  }
 0x30e   : > { %3402 = vsyncadd (!%p2800_p9), %s2389_s18, 4294967168  ;;  %s23_s20 = sadd.s32 1, %s3425_s20   ;;  %s4938_s15 = smov %s3409_s16 }
 0x30f   : > { %p20_p5 = scmp.ge.s32.totalorder %s23_s20, 6   ;;  %s4939_s16 = smov %s3413_s17 }
 0x310   : > { %s4940_s17 = smov %s3616_s23  ;;  %s4941_s18 = smov %s3421_s19 }
 0x311   : > { %s4942_s19 = smov %s4944_s10  ;;  %22 = sbr.rel (!%p20_p5) target bundleno = 8 (0x8), region = 115 }
 0x318   :  { %2394 = vsyncpa [#allocation5], 1 }
 0x319   :  { %2396 = vsyncpa [#allocation5 + $0x1], 1 }
 0x31a   :  { %2397 = vsyncpa [#allocation8], 1 }
 0x31b   :  { %2398 = vsyncpa [#allocation6], 1 }
 0x31c   :  { %2400 = vsyncpa [#allocation6 + $0x1], 1 }
 0x31d   :  { %2401 = vsyncpa [#allocation12], 1 }
 0x31e   :  { %2403 = vsyncpa [#allocation12 + $0x1], 1 }

</bundles_post_ra>
